<compile_context>
chip_gen: v7x
topology: tpu7x:2x2x1
jax: 0.10.0
libtpu: 0.0.40
codegen_flags: <defaults>
</compile_context>

<pallas_src>
import functools

import jax
import jax.numpy as jnp
from jax import lax
from jax.experimental import pallas as pl
from jax.experimental.pallas import tpu as pltpu

TAU = 2.0
V_TH = 0.5


# ------------------------------ Pallas kernels ------------------------------ #

def _mssa_attn_kernel(q_ref, kv_ref, wq_ref, wkv_ref, sq_ref, skv_ref, mask_ref,
                      z_ref, k_scr, v_scr, *, tau, v_th):
    """Fused: kv proj+BN -> v-LIF -> q proj+BN -> per-head cross attention.

    Block shapes (per grid step b):
      q_ref  : (T, 1, Nq, D)     raw q for batch b
      kv_ref : (T, 1, Nkv, D)    raw kv for batch b
      wq_ref : (D, D)            q weight, BN scale folded
      wkv_ref: (D, 2D)           [k | v] weights, BN scales folded
      sq_ref : (1, D)            q BN shift
      skv_ref: (1, 2D)           [k | v] BN shifts
      mask   : (D, D)            block-diagonal head mask * attention scale
      z_ref  : (Nq, 1, T, D)     output, already in permuted layout
      k_scr/v_scr : (Nkv, T, D)  VMEM scratch (k projection / v spikes)
    """
    T = q_ref.shape[0]
    Nkv = kv_ref.shape[2]
    D = q_ref.shape[3]
    inv_tau = 1.0 / tau

    wq = wq_ref[...]
    wkv = wkv_ref[...]
    sq = sq_ref[...]
    skv = skv_ref[...]
    m = mask_ref[...]

    # ---- stage 1: k/v projection + BN, v-LIF over time, stage into VMEM ---- #
    vm = jnp.zeros((Nkv, D), jnp.float32)
    for t in range(T):                                    # T is small & static
        y = jnp.dot(kv_ref[t, 0], wkv,
                    preferred_element_type=jnp.float32) + skv       # (Nkv, 2D)
        k_scr[:, t, :] = y[:, :D]
        h = vm + (y[:, D:] - vm) * inv_tau
        s = (h >= v_th).astype(jnp.float32)
        vm = h * (1.0 - s)
        v_scr[:, t, :] = s

    # ---- stage 2: q projection + BN, all-heads attention per leading index -- #
    # For leading index i (q time step == kv token, Nkv == T):
    #   z_i = q_i @ (mask * (k_i^T v_i)),  k_i = k_proj[:, i, :], v_i = v_spk[:, i, :]
    # which equals the per-head  (q_h @ k_h^T) @ v_h  concatenated over heads.
    for i in range(T):
        q_i = jnp.dot(q_ref[i, 0], wq,
                      preferred_element_type=jnp.float32) + sq      # (Nq, D)
        k_i = k_scr[i]                                              # (T, D)
        v_i = v_scr[i]                                              # (T, D)
        kvm = lax.dot_general(k_i, v_i, (((0,), (0,)), ((), ())),
                              preferred_element_type=jnp.float32)   # (D, D)
        z_ref[:, 0, i, :] = jnp.dot(q_i, kvm * m,
                                    preferred_element_type=jnp.float32)


def _epilogue_kernel(z_ref, wp_ref, sp_ref, o_ref, *, tau, v_th):
    """Fused: attn-LIF -> proj Linear (+folded BN) -> proj-LIF.

    z_ref/o_ref: (T, tile_m, D); wp_ref: (D, D); sp_ref: (1, D).
    """
    T, rows, D = z_ref.shape
    inv_tau = 1.0 / tau
    wp = wp_ref[...]
    sp = sp_ref[...]

    v1 = jnp.zeros((rows, D), jnp.float32)
    v2 = jnp.zeros((rows, D), jnp.float32)
    for t in range(T):
        x = z_ref[t]
        h1 = v1 + (x - v1) * inv_tau
        s1 = (h1 >= v_th).astype(jnp.float32)
        v1 = h1 * (1.0 - s1)
        y = jnp.dot(s1, wp, preferred_element_type=jnp.float32) + sp
        h2 = v2 + (y - v2) * inv_tau
        s2 = (h2 >= v_th).astype(jnp.float32)
        v2 = h2 * (1.0 - s2)
        o_ref[t] = s2


# ------------------------------ kernel wrappers ----------------------------- #

def mssa_attention(q, kv, wq_f, wkv_f, shift_q, shift_kv, mask, tau, v_th):
    T, B, Nq, D = q.shape
    _, _, Nkv, _ = kv.shape
    kern = functools.partial(_mssa_attn_kernel, tau=tau, v_th=v_th)
    return pl.pallas_call(
        kern,
        grid=(B,),
        in_specs=[
            pl.BlockSpec((T, 1, Nq, D), lambda b: (0, b, 0, 0)),
            pl.BlockSpec((T, 1, Nkv, D), lambda b: (0, b, 0, 0)),
            pl.BlockSpec((D, D), lambda b: (0, 0)),
            pl.BlockSpec((D, 2 * D), lambda b: (0, 0)),
            pl.BlockSpec((1, D), lambda b: (0, 0)),
            pl.BlockSpec((1, 2 * D), lambda b: (0, 0)),
            pl.BlockSpec((D, D), lambda b: (0, 0)),
        ],
        out_specs=pl.BlockSpec((Nq, 1, T, D), lambda b: (0, b, 0, 0)),
        out_shape=jax.ShapeDtypeStruct((Nq, B, T, D), jnp.float32),
        scratch_shapes=[pltpu.VMEM((Nkv, T, D), jnp.float32),
                        pltpu.VMEM((Nkv, T, D), jnp.float32)],
        compiler_params=pltpu.CompilerParams(dimension_semantics=("parallel",)),
    )(q, kv, wq_f, wkv_f, shift_q, shift_kv, mask)


def attn_proj_epilogue(z, wp_f, shift_p, tau, v_th, tile_m=256):
    T, M, D = z.shape
    tm = M if M <= tile_m else tile_m              # tile_m is a multiple of 8
    kern = functools.partial(_epilogue_kernel, tau=tau, v_th=v_th)
    return pl.pallas_call(
        kern,
        grid=(pl.cdiv(M, tm),),
        in_specs=[
            pl.BlockSpec((T, tm, D), lambda j: (0, j, 0)),
            pl.BlockSpec((D, D), lambda j: (0, 0)),
            pl.BlockSpec((1, D), lambda j: (0, 0)),
        ],
        out_specs=pl.BlockSpec((T, tm, D), lambda j: (0, j, 0)),
        out_shape=jax.ShapeDtypeStruct((T, M, D), jnp.float32),
        compiler_params=pltpu.CompilerParams(dimension_semantics=("parallel",)),
    )(z, wp_f, shift_p)


# ------------------------------- glue / model ------------------------------- #

def bn_fold(gamma, beta, mean, var, eps=1e-5):
    s = gamma * lax.rsqrt(var + eps)
    return s, beta - mean * s


def mutual_cross_attention(q, kv, params, num_heads=8, tau=TAU, v_th=V_TH):
    T, B, Nq, D = q.shape
    Tk, Bk, Nkv, Dk = kv.shape
    assert (T, B, D) == (Tk, Bk, Dk)
    assert Nkv == T, "torch matmul broadcasting in the reference needs Nkv == T"
    assert D % num_heads == 0
    H = num_heads
    Dh = D // H
    scale = float(D) ** -0.5

    sq, hq = bn_fold(*params["bnq"])
    sk, hk = bn_fold(*params["bnk"])
    sv, hv = bn_fold(*params["bnv"])
    sp, hp = bn_fold(*params["bnp"])

    # Fold BN scales into the (transposed) weights once, outside the hot path;
    # concatenate k/v weights so kv is projected with a single (D, 2D) matmul.
    wq_f = params["wq"].T * sq[None, :]
    wkv_f = jnp.concatenate(
        [params["wk"].T * sk[None, :], params["wv"].T * sv[None, :]], axis=1)
    wp_f = params["wp"].T * sp[None, :]
    shift_q = hq.reshape(1, D)
    shift_kv = jnp.concatenate([hk, hv]).reshape(1, 2 * D)
    shift_p = hp.reshape(1, D)

    # Block-diagonal per-head mask with the attention scale folded in:
    #   concat_h[(q_h @ k_h^T) @ v_h] * scale == q @ ((mask*scale) * (k^T v))
    head = jnp.arange(D, dtype=jnp.int32) // Dh
    mask = (head[:, None] == head[None, :]).astype(jnp.float32) * scale

    # Fused projection + attention; output is already in the permuted
    # (Nq, B, T, D) layout, so torch's permute(3,1,0,2,4).reshape(T,B,-1,D)
    # is a plain (flat-order) reshape here.
    zq = mssa_attention(q, kv, wq_f, wkv_f, shift_q, shift_kv, mask, tau, v_th)
    zr = zq.reshape(T, B * Nq, D)

    # Fused attn_lif -> proj_linear/proj_bn -> proj_lif.
    out = attn_proj_epilogue(zr, wp_f, shift_p, tau, v_th)
    return out.reshape(T, B, Nq, D)


# ------------------------------ pure-JAX reference --------------------------- #

def reference(q, kv, p, num_heads):
    T, B, Nq, D = q.shape
    _, _, Nkv, _ = kv.shape
    H = num_heads
    Dh = D // H
    scale = float(D) ** -0.5

    def linbn(x, w, bn):
        s, sh = bn_fold(*bn)
        return x @ w.T * s + sh

    def lif_ref(x, tau=TAU, v_th=V_TH):
        v = jnp.zeros_like(x[0])
        outs = []
        for t in range(x.shape[0]):
            h = v + (x[t] - v) / tau
            spk = (h >= v_th).astype(jnp.float32)
            v = h * (1.0 - spk)
            outs.append(spk)
        return jnp.stack(outs)

    qp = linbn(q.reshape(T * B, Nq, D), p["wq"], p["bnq"]).reshape(T, B, Nq, H, Dh)
    qp = jnp.swapaxes(qp, -2, -3)
    kp = linbn(kv.reshape(T * B, Nkv, D), p["wk"], p["bnk"]).reshape(T, B, Nkv, H, Dh)
    kp = jnp.swapaxes(kp, -2, -3)
    vp = linbn(kv.reshape(T * B, Nkv, D), p["wv"], p["bnv"]).reshape(T, B, Nkv, H, Dh)
    vp = lif_ref(vp)
    vp = jnp.swapaxes(vp, -2, -3)
    kp = jnp.swapaxes(kp, 0, 3)
    vp = jnp.swapaxes(vp, 0, 3)
    scores = jnp.matmul(qp, jnp.swapaxes(kp, -1, -2))
    z = jnp.matmul(scores, vp) * scale
    z = jnp.transpose(z, (3, 1, 0, 2, 4)).reshape(T, B, -1, D)
    z = lif_ref(z)
    zp = linbn(z.reshape(T * B, -1, D), p["wp"], p["bnp"]).reshape(T, B, -1, D)
    return lif_ref(zp)


# ----------------------------------- main ------------------------------------ #

if __name__ == "__main__":
    T, B, Nq, Nkv, D, H = 4, 2, 8, 4, 32, 8   # Nkv must equal T (see assert above)

    key = jax.random.PRNGKey(0)
    ks = jax.random.split(key, 10)

    def init_lin(k):
        return jax.random.normal(k, (D, D), jnp.float32) * 0.1

    def init_bn(k):
        k1, k2, k3, k4 = jax.random.split(k, 4)
        return (1.0 + 0.1 * jax.random.normal(k1, (D,), jnp.float32),   # gamma
                0.1 * jax.random.normal(k2, (D,), jnp.float32),         # beta
                0.1 * jax.random.normal(k3, (D,), jnp.float32),         # running_mean
                jax.random.uniform(k4, (D,), jnp.float32, 0.5, 1.5))    # running_var

    params = dict(
        wq=init_lin(ks[0]), bnq=init_bn(ks[1]),
        wk=init_lin(ks[2]), bnk=init_bn(ks[3]),
        wv=init_lin(ks[4]), bnv=init_bn(ks[5]),
        wp=init_lin(ks[6]), bnp=init_bn(ks[7]),
    )

    q = jax.random.normal(ks[8], (T, B, Nq, D), jnp.float32)
    kv = jax.random.normal(ks[9], (T, B, Nkv, D), jnp.float32)

    out = mutual_cross_attention(q, kv, params, num_heads=H)
    out = jax.block_until_ready(out)

    assert out.shape == (T, B, Nq, D)
    ref = reference(q, kv, params, num_heads=H)
    err = float(jnp.mean(jnp.abs(out - ref)))
    assert err < 1e-2, f"mismatch vs pure-JAX reference: {err}"

    print("KERNEL_OK")
</pallas_src>

<mosaic_0001>
module attributes {stable_mosaic.version = 11 : i64} {
  func.func @_mssa_attn_kernel(%arg0: i32, %arg1: memref<4x1x8x32xf32, #tpu.memory_space<vmem>>, %arg2: memref<4x1x4x32xf32, #tpu.memory_space<vmem>>, %arg3: memref<32x32xf32, #tpu.memory_space<vmem>>, %arg4: memref<32x64xf32, #tpu.memory_space<vmem>>, %arg5: memref<1x32xf32, #tpu.memory_space<vmem>>, %arg6: memref<1x64xf32, #tpu.memory_space<vmem>>, %arg7: memref<32x32xf32, #tpu.memory_space<vmem>>, %arg8: memref<8x1x4x32xf32, #tpu.memory_space<vmem>>, %arg9: memref<4x4x32xf32, #tpu.memory_space<vmem>>, %arg10: memref<4x4x32xf32, #tpu.memory_space<vmem>>) attributes {dimension_semantics = [#tpu.dimension_semantics<parallel>], iteration_bounds = array<i64: 2>, scalar_prefetch = 0 : i64, scratch_operands = 2 : i64, tpu.core_type = #tpu.core_type<tc>, window_params = [{transform_indices = @transform_0, window_bounds = array<i64: 4, 1, 8, 32>}, {transform_indices = @transform_1, window_bounds = array<i64: 4, 1, 4, 32>}, {pipeline_mode = #tpu.pipeline_mode<synchronous>, transform_indices = @transform_2, window_bounds = array<i64: 32, 32>}, {pipeline_mode = #tpu.pipeline_mode<synchronous>, transform_indices = @transform_3, window_bounds = array<i64: 32, 64>}, {pipeline_mode = #tpu.pipeline_mode<synchronous>, transform_indices = @transform_4, window_bounds = array<i64: 1, 32>}, {pipeline_mode = #tpu.pipeline_mode<synchronous>, transform_indices = @transform_5, window_bounds = array<i64: 1, 64>}, {pipeline_mode = #tpu.pipeline_mode<synchronous>, transform_indices = @transform_6, window_bounds = array<i64: 32, 32>}, {transform_indices = @transform_7, window_bounds = array<i64: 8, 1, 4, 32>}]} {
    %c0 = arith.constant 0 : index
    %c0_0 = arith.constant 0 : index
    %0 = vector.load %arg3[%c0, %c0_0] : memref<32x32xf32, #tpu.memory_space<vmem>>, vector<32x32xf32>
    %c0_1 = arith.constant 0 : index
    %c0_2 = arith.constant 0 : index
    %1 = vector.load %arg4[%c0_1, %c0_2] : memref<32x64xf32, #tpu.memory_space<vmem>>, vector<32x64xf32>
    %c0_3 = arith.constant 0 : index
    %c0_4 = arith.constant 0 : index
    %2 = vector.load %arg5[%c0_3, %c0_4] : memref<1x32xf32, #tpu.memory_space<vmem>>, vector<1x32xf32>
    %c0_5 = arith.constant 0 : index
    %c0_6 = arith.constant 0 : index
    %3 = vector.load %arg6[%c0_5, %c0_6] : memref<1x64xf32, #tpu.memory_space<vmem>>, vector<1x64xf32>
    %c0_7 = arith.constant 0 : index
    %c0_8 = arith.constant 0 : index
    %4 = vector.load %arg7[%c0_7, %c0_8] : memref<32x32xf32, #tpu.memory_space<vmem>>, vector<32x32xf32>
    %cst = arith.constant 0.000000e+00 : f32
    %5 = vector.broadcast %cst : f32 to vector<4x32xf32>
    %c0_9 = arith.constant 0 : index
    %c0_10 = arith.constant 0 : index
    %c0_11 = arith.constant 0 : index
    %c0_12 = arith.constant 0 : index
    %6 = vector.load %arg2[%c0_9, %c0_10, %c0_11, %c0_12] : memref<4x1x4x32xf32, #tpu.memory_space<vmem>>, vector<1x1x4x32xf32>
    %7 = vector.shape_cast %6 : vector<1x1x4x32xf32> to vector<4x32xf32>
    %cst_13 = arith.constant dense<0.000000e+00> : vector<4x64xf32>
    %8 = tpu.matmul %7, %1, %cst_13 {dimension_numbers = #tpu.dot_dimension_numbers<[1], [0], [0], [1], [0, 0, 1, 1], [], []>} : vector<4x32xf32>, vector<32x64xf32>, vector<4x64xf32> -> vector<4x64xf32>
    %9 = vector.broadcast %3 : vector<1x64xf32> to vector<4x64xf32>
    %10 = arith.addf %8, %9 : vector<4x64xf32>
    %11 = vector.extract_strided_slice %10 {offsets = [0, 0], sizes = [4, 32], strides = [1, 1]} : vector<4x64xf32> to vector<4x32xf32>
    %c0_14 = arith.constant 0 : index
    %c0_15 = arith.constant 0 : index
    %c0_16 = arith.constant 0 : index
    %12 = vector.load %arg9[%c0_14, %c0_15, %c0_16] : memref<4x4x32xf32, #tpu.memory_space<vmem>>, vector<4x1x32xf32>
    %13 = vector.shape_cast %12 : vector<4x1x32xf32> to vector<4x32xf32>
    %14 = vector.shape_cast %11 : vector<4x32xf32> to vector<4x1x32xf32>
    tpu.vector_store %arg9[%c0_14, %c0_15, %c0_16], %14 {strides = array<i32>} : memref<4x4x32xf32, #tpu.memory_space<vmem>>, vector<4x1x32xf32>,
    %15 = vector.extract_strided_slice %10 {offsets = [0, 32], sizes = [4, 32], strides = [1, 1]} : vector<4x64xf32> to vector<4x32xf32>
    %16 = arith.subf %15, %5 : vector<4x32xf32>
    %cst_17 = arith.constant 5.000000e-01 : f32
    %17 = vector.broadcast %cst_17 : f32 to vector<4x32xf32>
    %18 = arith.mulf %16, %17 : vector<4x32xf32>
    %19 = arith.addf %5, %18 : vector<4x32xf32>
    %cst_18 = arith.constant 5.000000e-01 : f32
    %20 = vector.broadcast %cst_18 : f32 to vector<4x32xf32>
    %21 = arith.cmpf oge, %19, %20 : vector<4x32xf32>
    %22 = arith.extui %21 : vector<4x32xi1> to vector<4x32xi32>
    %23 = arith.sitofp %22 : vector<4x32xi32> to vector<4x32xf32>
    %cst_19 = arith.constant 1.000000e+00 : f32
    %24 = vector.broadcast %cst_19 : f32 to vector<4x32xf32>
    %25 = arith.subf %24, %23 : vector<4x32xf32>
    %26 = arith.mulf %19, %25 : vector<4x32xf32>
    %c0_20 = arith.constant 0 : index
    %c0_21 = arith.constant 0 : index
    %c0_22 = arith.constant 0 : index
    %27 = vector.load %arg10[%c0_20, %c0_21, %c0_22] : memref<4x4x32xf32, #tpu.memory_space<vmem>>, vector<4x1x32xf32>
    %28 = vector.shape_cast %27 : vector<4x1x32xf32> to vector<4x32xf32>
    %29 = vector.shape_cast %23 : vector<4x32xf32> to vector<4x1x32xf32>
    tpu.vector_store %arg10[%c0_20, %c0_21, %c0_22], %29 {strides = array<i32>} : memref<4x4x32xf32, #tpu.memory_space<vmem>>, vector<4x1x32xf32>,
    %c1 = arith.constant 1 : index
    %c0_23 = arith.constant 0 : index
    %c0_24 = arith.constant 0 : index
    %c0_25 = arith.constant 0 : index
    %30 = vector.load %arg2[%c1, %c0_23, %c0_24, %c0_25] : memref<4x1x4x32xf32, #tpu.memory_space<vmem>>, vector<1x1x4x32xf32>
    %31 = vector.shape_cast %30 : vector<1x1x4x32xf32> to vector<4x32xf32>
    %cst_26 = arith.constant dense<0.000000e+00> : vector<4x64xf32>
    %32 = tpu.matmul %31, %1, %cst_26 {dimension_numbers = #tpu.dot_dimension_numbers<[1], [0], [0], [1], [0, 0, 1, 1], [], []>} : vector<4x32xf32>, vector<32x64xf32>, vector<4x64xf32> -> vector<4x64xf32>
    %33 = vector.broadcast %3 : vector<1x64xf32> to vector<4x64xf32>
    %34 = arith.addf %32, %33 : vector<4x64xf32>
    %35 = vector.extract_strided_slice %34 {offsets = [0, 0], sizes = [4, 32], strides = [1, 1]} : vector<4x64xf32> to vector<4x32xf32>
    %c0_27 = arith.constant 0 : index
    %c1_28 = arith.constant 1 : index
    %c0_29 = arith.constant 0 : index
    %36 = vector.load %arg9[%c0_27, %c1_28, %c0_29] : memref<4x4x32xf32, #tpu.memory_space<vmem>>, vector<4x1x32xf32>
    %37 = vector.shape_cast %36 : vector<4x1x32xf32> to vector<4x32xf32>
    %38 = vector.shape_cast %35 : vector<4x32xf32> to vector<4x1x32xf32>
    tpu.vector_store %arg9[%c0_27, %c1_28, %c0_29], %38 {strides = array<i32>} : memref<4x4x32xf32, #tpu.memory_space<vmem>>, vector<4x1x32xf32>,
    %39 = vector.extract_strided_slice %34 {offsets = [0, 32], sizes = [4, 32], strides = [1, 1]} : vector<4x64xf32> to vector<4x32xf32>
    %40 = arith.subf %39, %26 : vector<4x32xf32>
    %cst_30 = arith.constant 5.000000e-01 : f32
    %41 = vector.broadcast %cst_30 : f32 to vector<4x32xf32>
    %42 = arith.mulf %40, %41 : vector<4x32xf32>
    %43 = arith.addf %26, %42 : vector<4x32xf32>
    %cst_31 = arith.constant 5.000000e-01 : f32
    %44 = vector.broadcast %cst_31 : f32 to vector<4x32xf32>
    %45 = arith.cmpf oge, %43, %44 : vector<4x32xf32>
    %46 = arith.extui %45 : vector<4x32xi1> to vector<4x32xi32>
    %47 = arith.sitofp %46 : vector<4x32xi32> to vector<4x32xf32>
    %cst_32 = arith.constant 1.000000e+00 : f32
    %48 = vector.broadcast %cst_32 : f32 to vector<4x32xf32>
    %49 = arith.subf %48, %47 : vector<4x32xf32>
    %50 = arith.mulf %43, %49 : vector<4x32xf32>
    %c0_33 = arith.constant 0 : index
    %c1_34 = arith.constant 1 : index
    %c0_35 = arith.constant 0 : index
    %51 = vector.load %arg10[%c0_33, %c1_34, %c0_35] : memref<4x4x32xf32, #tpu.memory_space<vmem>>, vector<4x1x32xf32>
    %52 = vector.shape_cast %51 : vector<4x1x32xf32> to vector<4x32xf32>
    %53 = vector.shape_cast %47 : vector<4x32xf32> to vector<4x1x32xf32>
    tpu.vector_store %arg10[%c0_33, %c1_34, %c0_35], %53 {strides = array<i32>} : memref<4x4x32xf32, #tpu.memory_space<vmem>>, vector<4x1x32xf32>,
    %c2 = arith.constant 2 : index
    %c0_36 = arith.constant 0 : index
    %c0_37 = arith.constant 0 : index
    %c0_38 = arith.constant 0 : index
    %54 = vector.load %arg2[%c2, %c0_36, %c0_37, %c0_38] : memref<4x1x4x32xf32, #tpu.memory_space<vmem>>, vector<1x1x4x32xf32>
    %55 = vector.shape_cast %54 : vector<1x1x4x32xf32> to vector<4x32xf32>
    %cst_39 = arith.constant dense<0.000000e+00> : vector<4x64xf32>
    %56 = tpu.matmul %55, %1, %cst_39 {dimension_numbers = #tpu.dot_dimension_numbers<[1], [0], [0], [1], [0, 0, 1, 1], [], []>} : vector<4x32xf32>, vector<32x64xf32>, vector<4x64xf32> -> vector<4x64xf32>
    %57 = vector.broadcast %3 : vector<1x64xf32> to vector<4x64xf32>
    %58 = arith.addf %56, %57 : vector<4x64xf32>
    %59 = vector.extract_strided_slice %58 {offsets = [0, 0], sizes = [4, 32], strides = [1, 1]} : vector<4x64xf32> to vector<4x32xf32>
    %c0_40 = arith.constant 0 : index
    %c2_41 = arith.constant 2 : index
    %c0_42 = arith.constant 0 : index
    %60 = vector.load %arg9[%c0_40, %c2_41, %c0_42] : memref<4x4x32xf32, #tpu.memory_space<vmem>>, vector<4x1x32xf32>
    %61 = vector.shape_cast %60 : vector<4x1x32xf32> to vector<4x32xf32>
    %62 = vector.shape_cast %59 : vector<4x32xf32> to vector<4x1x32xf32>
    tpu.vector_store %arg9[%c0_40, %c2_41, %c0_42], %62 {strides = array<i32>} : memref<4x4x32xf32, #tpu.memory_space<vmem>>, vector<4x1x32xf32>,
    %63 = vector.extract_strided_slice %58 {offsets = [0, 32], sizes = [4, 32], strides = [1, 1]} : vector<4x64xf32> to vector<4x32xf32>
    %64 = arith.subf %63, %50 : vector<4x32xf32>
    %cst_43 = arith.constant 5.000000e-01 : f32
    %65 = vector.broadcast %cst_43 : f32 to vector<4x32xf32>
    %66 = arith.mulf %64, %65 : vector<4x32xf32>
    %67 = arith.addf %50, %66 : vector<4x32xf32>
    %cst_44 = arith.constant 5.000000e-01 : f32
    %68 = vector.broadcast %cst_44 : f32 to vector<4x32xf32>
    %69 = arith.cmpf oge, %67, %68 : vector<4x32xf32>
    %70 = arith.extui %69 : vector<4x32xi1> to vector<4x32xi32>
    %71 = arith.sitofp %70 : vector<4x32xi32> to vector<4x32xf32>
    %cst_45 = arith.constant 1.000000e+00 : f32
    %72 = vector.broadcast %cst_45 : f32 to vector<4x32xf32>
    %73 = arith.subf %72, %71 : vector<4x32xf32>
    %74 = arith.mulf %67, %73 : vector<4x32xf32>
    %c0_46 = arith.constant 0 : index
    %c2_47 = arith.constant 2 : index
    %c0_48 = arith.constant 0 : index
    %75 = vector.load %arg10[%c0_46, %c2_47, %c0_48] : memref<4x4x32xf32, #tpu.memory_space<vmem>>, vector<4x1x32xf32>
    %76 = vector.shape_cast %75 : vector<4x1x32xf32> to vector<4x32xf32>
    %77 = vector.shape_cast %71 : vector<4x32xf32> to vector<4x1x32xf32>
    tpu.vector_store %arg10[%c0_46, %c2_47, %c0_48], %77 {strides = array<i32>} : memref<4x4x32xf32, #tpu.memory_space<vmem>>, vector<4x1x32xf32>,
    %c3 = arith.constant 3 : index
    %c0_49 = arith.constant 0 : index
    %c0_50 = arith.constant 0 : index
    %c0_51 = arith.constant 0 : index
    %78 = vector.load %arg2[%c3, %c0_49, %c0_50, %c0_51] : memref<4x1x4x32xf32, #tpu.memory_space<vmem>>, vector<1x1x4x32xf32>
    %79 = vector.shape_cast %78 : vector<1x1x4x32xf32> to vector<4x32xf32>
    %cst_52 = arith.constant dense<0.000000e+00> : vector<4x64xf32>
    %80 = tpu.matmul %79, %1, %cst_52 {dimension_numbers = #tpu.dot_dimension_numbers<[1], [0], [0], [1], [0, 0, 1, 1], [], []>} : vector<4x32xf32>, vector<32x64xf32>, vector<4x64xf32> -> vector<4x64xf32>
    %81 = vector.broadcast %3 : vector<1x64xf32> to vector<4x64xf32>
    %82 = arith.addf %80, %81 : vector<4x64xf32>
    %83 = vector.extract_strided_slice %82 {offsets = [0, 0], sizes = [4, 32], strides = [1, 1]} : vector<4x64xf32> to vector<4x32xf32>
    %c0_53 = arith.constant 0 : index
    %c3_54 = arith.constant 3 : index
    %c0_55 = arith.constant 0 : index
    %84 = vector.load %arg9[%c0_53, %c3_54, %c0_55] : memref<4x4x32xf32, #tpu.memory_space<vmem>>, vector<4x1x32xf32>
    %85 = vector.shape_cast %84 : vector<4x1x32xf32> to vector<4x32xf32>
    %86 = vector.shape_cast %83 : vector<4x32xf32> to vector<4x1x32xf32>
    tpu.vector_store %arg9[%c0_53, %c3_54, %c0_55], %86 {strides = array<i32>} : memref<4x4x32xf32, #tpu.memory_space<vmem>>, vector<4x1x32xf32>,
    %87 = vector.extract_strided_slice %82 {offsets = [0, 32], sizes = [4, 32], strides = [1, 1]} : vector<4x64xf32> to vector<4x32xf32>
    %88 = arith.subf %87, %74 : vector<4x32xf32>
    %cst_56 = arith.constant 5.000000e-01 : f32
    %89 = vector.broadcast %cst_56 : f32 to vector<4x32xf32>
    %90 = arith.mulf %88, %89 : vector<4x32xf32>
    %91 = arith.addf %74, %90 : vector<4x32xf32>
    %cst_57 = arith.constant 5.000000e-01 : f32
    %92 = vector.broadcast %cst_57 : f32 to vector<4x32xf32>
    %93 = arith.cmpf oge, %91, %92 : vector<4x32xf32>
    %94 = arith.extui %93 : vector<4x32xi1> to vector<4x32xi32>
    %95 = arith.sitofp %94 : vector<4x32xi32> to vector<4x32xf32>
    %c0_58 = arith.constant 0 : index
    %c3_59 = arith.constant 3 : index
    %c0_60 = arith.constant 0 : index
    %96 = vector.load %arg10[%c0_58, %c3_59, %c0_60] : memref<4x4x32xf32, #tpu.memory_space<vmem>>, vector<4x1x32xf32>
    %97 = vector.shape_cast %96 : vector<4x1x32xf32> to vector<4x32xf32>
    %98 = vector.shape_cast %95 : vector<4x32xf32> to vector<4x1x32xf32>
    tpu.vector_store %arg10[%c0_58, %c3_59, %c0_60], %98 {strides = array<i32>} : memref<4x4x32xf32, #tpu.memory_space<vmem>>, vector<4x1x32xf32>,
    %c0_61 = arith.constant 0 : index
    %c0_62 = arith.constant 0 : index
    %c0_63 = arith.constant 0 : index
    %c0_64 = arith.constant 0 : index
    %99 = vector.load %arg1[%c0_61, %c0_62, %c0_63, %c0_64] : memref<4x1x8x32xf32, #tpu.memory_space<vmem>>, vector<1x1x8x32xf32>
    %100 = vector.shape_cast %99 : vector<1x1x8x32xf32> to vector<8x32xf32>
    %cst_65 = arith.constant dense<0.000000e+00> : vector<8x32xf32>
    %101 = tpu.matmul %100, %0, %cst_65 {dimension_numbers = #tpu.dot_dimension_numbers<[1], [0], [0], [1], [0, 0, 1, 1], [], []>} : vector<8x32xf32>, vector<32x32xf32>, vector<8x32xf32> -> vector<8x32xf32>
    %102 = vector.broadcast %2 : vector<1x32xf32> to vector<8x32xf32>
    %103 = arith.addf %101, %102 : vector<8x32xf32>
    %c0_66 = arith.constant 0 : index
    %c0_67 = arith.constant 0 : index
    %c0_68 = arith.constant 0 : index
    %104 = vector.load %arg9[%c0_66, %c0_67, %c0_68] : memref<4x4x32xf32, #tpu.memory_space<vmem>>, vector<1x4x32xf32>
    %105 = vector.shape_cast %104 : vector<1x4x32xf32> to vector<4x32xf32>
    %c0_69 = arith.constant 0 : index
    %c0_70 = arith.constant 0 : index
    %c0_71 = arith.constant 0 : index
    %106 = vector.load %arg10[%c0_69, %c0_70, %c0_71] : memref<4x4x32xf32, #tpu.memory_space<vmem>>, vector<1x4x32xf32>
    %107 = vector.shape_cast %106 : vector<1x4x32xf32> to vector<4x32xf32>
    %cst_72 = arith.constant dense<0.000000e+00> : vector<32x32xf32>
    %108 = tpu.matmul %105, %107, %cst_72 {dimension_numbers = #tpu.dot_dimension_numbers<[0], [0], [1], [1], [0, 1, 1, 1], [], []>} : vector<4x32xf32>, vector<4x32xf32>, vector<32x32xf32> -> vector<32x32xf32>
    %109 = arith.mulf %108, %4 : vector<32x32xf32>
    %cst_73 = arith.constant dense<0.000000e+00> : vector<8x32xf32>
    %110 = tpu.matmul %103, %109, %cst_73 {dimension_numbers = #tpu.dot_dimension_numbers<[1], [0], [0], [1], [0, 0, 1, 1], [], []>} : vector<8x32xf32>, vector<32x32xf32>, vector<8x32xf32> -> vector<8x32xf32>
    %c0_74 = arith.constant 0 : index
    %c0_75 = arith.constant 0 : index
    %c0_76 = arith.constant 0 : index
    %c0_77 = arith.constant 0 : index
    %111 = vector.load %arg8[%c0_74, %c0_75, %c0_76, %c0_77] : memref<8x1x4x32xf32, #tpu.memory_space<vmem>>, vector<8x1x1x32xf32>
    %112 = vector.shape_cast %111 : vector<8x1x1x32xf32> to vector<8x32xf32>
    %113 = vector.shape_cast %110 : vector<8x32xf32> to vector<8x1x1x32xf32>
    tpu.vector_store %arg8[%c0_74, %c0_75, %c0_76, %c0_77], %113 {strides = array<i32>} : memref<8x1x4x32xf32, #tpu.memory_space<vmem>>, vector<8x1x1x32xf32>,
    %c1_78 = arith.constant 1 : index
    %c0_79 = arith.constant 0 : index
    %c0_80 = arith.constant 0 : index
    %c0_81 = arith.constant 0 : index
    %114 = vector.load %arg1[%c1_78, %c0_79, %c0_80, %c0_81] : memref<4x1x8x32xf32, #tpu.memory_space<vmem>>, vector<1x1x8x32xf32>
    %115 = vector.shape_cast %114 : vector<1x1x8x32xf32> to vector<8x32xf32>
    %cst_82 = arith.constant dense<0.000000e+00> : vector<8x32xf32>
    %116 = tpu.matmul %115, %0, %cst_82 {dimension_numbers = #tpu.dot_dimension_numbers<[1], [0], [0], [1], [0, 0, 1, 1], [], []>} : vector<8x32xf32>, vector<32x32xf32>, vector<8x32xf32> -> vector<8x32xf32>
    %117 = vector.broadcast %2 : vector<1x32xf32> to vector<8x32xf32>
    %118 = arith.addf %116, %117 : vector<8x32xf32>
    %c1_83 = arith.constant 1 : index
    %c0_84 = arith.constant 0 : index
    %c0_85 = arith.constant 0 : index
    %119 = vector.load %arg9[%c1_83, %c0_84, %c0_85] : memref<4x4x32xf32, #tpu.memory_space<vmem>>, vector<1x4x32xf32>
    %120 = vector.shape_cast %119 : vector<1x4x32xf32> to vector<4x32xf32>
    %c1_86 = arith.constant 1 : index
    %c0_87 = arith.constant 0 : index
    %c0_88 = arith.constant 0 : index
    %121 = vector.load %arg10[%c1_86, %c0_87, %c0_88] : memref<4x4x32xf32, #tpu.memory_space<vmem>>, vector<1x4x32xf32>
    %122 = vector.shape_cast %121 : vector<1x4x32xf32> to vector<4x32xf32>
    %cst_89 = arith.constant dense<0.000000e+00> : vector<32x32xf32>
    %123 = tpu.matmul %120, %122, %cst_89 {dimension_numbers = #tpu.dot_dimension_numbers<[0], [0], [1], [1], [0, 1, 1, 1], [], []>} : vector<4x32xf32>, vector<4x32xf32>, vector<32x32xf32> -> vector<32x32xf32>
    %124 = arith.mulf %123, %4 : vector<32x32xf32>
    %cst_90 = arith.constant dense<0.000000e+00> : vector<8x32xf32>
    %125 = tpu.matmul %118, %124, %cst_90 {dimension_numbers = #tpu.dot_dimension_numbers<[1], [0], [0], [1], [0, 0, 1, 1], [], []>} : vector<8x32xf32>, vector<32x32xf32>, vector<8x32xf32> -> vector<8x32xf32>
    %c0_91 = arith.constant 0 : index
    %c0_92 = arith.constant 0 : index
    %c1_93 = arith.constant 1 : index
    %c0_94 = arith.constant 0 : index
    %126 = vector.load %arg8[%c0_91, %c0_92, %c1_93, %c0_94] : memref<8x1x4x32xf32, #tpu.memory_space<vmem>>, vector<8x1x1x32xf32>
    %127 = vector.shape_cast %126 : vector<8x1x1x32xf32> to vector<8x32xf32>
    %128 = vector.shape_cast %125 : vector<8x32xf32> to vector<8x1x1x32xf32>
    tpu.vector_store %arg8[%c0_91, %c0_92, %c1_93, %c0_94], %128 {strides = array<i32>} : memref<8x1x4x32xf32, #tpu.memory_space<vmem>>, vector<8x1x1x32xf32>,
    %c2_95 = arith.constant 2 : index
    %c0_96 = arith.constant 0 : index
    %c0_97 = arith.constant 0 : index
    %c0_98 = arith.constant 0 : index
    %129 = vector.load %arg1[%c2_95, %c0_96, %c0_97, %c0_98] : memref<4x1x8x32xf32, #tpu.memory_space<vmem>>, vector<1x1x8x32xf32>
    %130 = vector.shape_cast %129 : vector<1x1x8x32xf32> to vector<8x32xf32>
    %cst_99 = arith.constant dense<0.000000e+00> : vector<8x32xf32>
    %131 = tpu.matmul %130, %0, %cst_99 {dimension_numbers = #tpu.dot_dimension_numbers<[1], [0], [0], [1], [0, 0, 1, 1], [], []>} : vector<8x32xf32>, vector<32x32xf32>, vector<8x32xf32> -> vector<8x32xf32>
    %132 = vector.broadcast %2 : vector<1x32xf32> to vector<8x32xf32>
    %133 = arith.addf %131, %132 : vector<8x32xf32>
    %c2_100 = arith.constant 2 : index
    %c0_101 = arith.constant 0 : index
    %c0_102 = arith.constant 0 : index
    %134 = vector.load %arg9[%c2_100, %c0_101, %c0_102] : memref<4x4x32xf32, #tpu.memory_space<vmem>>, vector<1x4x32xf32>
    %135 = vector.shape_cast %134 : vector<1x4x32xf32> to vector<4x32xf32>
    %c2_103 = arith.constant 2 : index
    %c0_104 = arith.constant 0 : index
    %c0_105 = arith.constant 0 : index
    %136 = vector.load %arg10[%c2_103, %c0_104, %c0_105] : memref<4x4x32xf32, #tpu.memory_space<vmem>>, vector<1x4x32xf32>
    %137 = vector.shape_cast %136 : vector<1x4x32xf32> to vector<4x32xf32>
    %cst_106 = arith.constant dense<0.000000e+00> : vector<32x32xf32>
    %138 = tpu.matmul %135, %137, %cst_106 {dimension_numbers = #tpu.dot_dimension_numbers<[0], [0], [1], [1], [0, 1, 1, 1], [], []>} : vector<4x32xf32>, vector<4x32xf32>, vector<32x32xf32> -> vector<32x32xf32>
    %139 = arith.mulf %138, %4 : vector<32x32xf32>
    %cst_107 = arith.constant dense<0.000000e+00> : vector<8x32xf32>
    %140 = tpu.matmul %133, %139, %cst_107 {dimension_numbers = #tpu.dot_dimension_numbers<[1], [0], [0], [1], [0, 0, 1, 1], [], []>} : vector<8x32xf32>, vector<32x32xf32>, vector<8x32xf32> -> vector<8x32xf32>
    %c0_108 = arith.constant 0 : index
    %c0_109 = arith.constant 0 : index
    %c2_110 = arith.constant 2 : index
    %c0_111 = arith.constant 0 : index
    %141 = vector.load %arg8[%c0_108, %c0_109, %c2_110, %c0_111] : memref<8x1x4x32xf32, #tpu.memory_space<vmem>>, vector<8x1x1x32xf32>
    %142 = vector.shape_cast %141 : vector<8x1x1x32xf32> to vector<8x32xf32>
    %143 = vector.shape_cast %140 : vector<8x32xf32> to vector<8x1x1x32xf32>
    tpu.vector_store %arg8[%c0_108, %c0_109, %c2_110, %c0_111], %143 {strides = array<i32>} : memref<8x1x4x32xf32, #tpu.memory_space<vmem>>, vector<8x1x1x32xf32>,
    %c3_112 = arith.constant 3 : index
    %c0_113 = arith.constant 0 : index
    %c0_114 = arith.constant 0 : index
    %c0_115 = arith.constant 0 : index
    %144 = vector.load %arg1[%c3_112, %c0_113, %c0_114, %c0_115] : memref<4x1x8x32xf32, #tpu.memory_space<vmem>>, vector<1x1x8x32xf32>
    %145 = vector.shape_cast %144 : vector<1x1x8x32xf32> to vector<8x32xf32>
    %cst_116 = arith.constant dense<0.000000e+00> : vector<8x32xf32>
    %146 = tpu.matmul %145, %0, %cst_116 {dimension_numbers = #tpu.dot_dimension_numbers<[1], [0], [0], [1], [0, 0, 1, 1], [], []>} : vector<8x32xf32>, vector<32x32xf32>, vector<8x32xf32> -> vector<8x32xf32>
    %147 = vector.broadcast %2 : vector<1x32xf32> to vector<8x32xf32>
    %148 = arith.addf %146, %147 : vector<8x32xf32>
    %c3_117 = arith.constant 3 : index
    %c0_118 = arith.constant 0 : index
    %c0_119 = arith.constant 0 : index
    %149 = vector.load %arg9[%c3_117, %c0_118, %c0_119] : memref<4x4x32xf32, #tpu.memory_space<vmem>>, vector<1x4x32xf32>
    %150 = vector.shape_cast %149 : vector<1x4x32xf32> to vector<4x32xf32>
    %c3_120 = arith.constant 3 : index
    %c0_121 = arith.constant 0 : index
    %c0_122 = arith.constant 0 : index
    %151 = vector.load %arg10[%c3_120, %c0_121, %c0_122] : memref<4x4x32xf32, #tpu.memory_space<vmem>>, vector<1x4x32xf32>
    %152 = vector.shape_cast %151 : vector<1x4x32xf32> to vector<4x32xf32>
    %cst_123 = arith.constant dense<0.000000e+00> : vector<32x32xf32>
    %153 = tpu.matmul %150, %152, %cst_123 {dimension_numbers = #tpu.dot_dimension_numbers<[0], [0], [1], [1], [0, 1, 1, 1], [], []>} : vector<4x32xf32>, vector<4x32xf32>, vector<32x32xf32> -> vector<32x32xf32>
    %154 = arith.mulf %153, %4 : vector<32x32xf32>
    %cst_124 = arith.constant dense<0.000000e+00> : vector<8x32xf32>
    %155 = tpu.matmul %148, %154, %cst_124 {dimension_numbers = #tpu.dot_dimension_numbers<[1], [0], [0], [1], [0, 0, 1, 1], [], []>} : vector<8x32xf32>, vector<32x32xf32>, vector<8x32xf32> -> vector<8x32xf32>
    %c0_125 = arith.constant 0 : index
    %c0_126 = arith.constant 0 : index
    %c3_127 = arith.constant 3 : index
    %c0_128 = arith.constant 0 : index
    %156 = vector.load %arg8[%c0_125, %c0_126, %c3_127, %c0_128] : memref<8x1x4x32xf32, #tpu.memory_space<vmem>>, vector<8x1x1x32xf32>
    %157 = vector.shape_cast %156 : vector<8x1x1x32xf32> to vector<8x32xf32>
    %158 = vector.shape_cast %155 : vector<8x32xf32> to vector<8x1x1x32xf32>
    tpu.vector_store %arg8[%c0_125, %c0_126, %c3_127, %c0_128], %158 {strides = array<i32>} : memref<8x1x4x32xf32, #tpu.memory_space<vmem>>, vector<8x1x1x32xf32>,
    return
  }
  func.func @transform_0(%arg0: i32) -> (i32, i32, i32, i32) {
    %c0_i32 = arith.constant 0 : i32
    %c0_i32_0 = arith.constant 0 : i32
    %c0_i32_1 = arith.constant 0 : i32
    %c0_i32_2 = arith.constant 0 : i32
    return %c0_i32, %arg0, %c0_i32_0, %c0_i32_1 : i32, i32, i32, i32
  }
  func.func @transform_1(%arg0: i32) -> (i32, i32, i32, i32) {
    %c0_i32 = arith.constant 0 : i32
    %c0_i32_0 = arith.constant 0 : i32
    %c0_i32_1 = arith.constant 0 : i32
    %c0_i32_2 = arith.constant 0 : i32
    return %c0_i32, %arg0, %c0_i32_0, %c0_i32_1 : i32, i32, i32, i32
  }
  func.func @transform_2(%arg0: i32) -> (i32, i32) {
    %c0_i32 = arith.constant 0 : i32
    %c0_i32_0 = arith.constant 0 : i32
    %c0_i32_1 = arith.constant 0 : i32
    return %c0_i32, %c0_i32_0 : i32, i32
  }
  func.func @transform_3(%arg0: i32) -> (i32, i32) {
    %c0_i32 = arith.constant 0 : i32
    %c0_i32_0 = arith.constant 0 : i32
    %c0_i32_1 = arith.constant 0 : i32
    return %c0_i32, %c0_i32_0 : i32, i32
  }
  func.func @transform_4(%arg0: i32) -> (i32, i32) {
    %c0_i32 = arith.constant 0 : i32
    %c0_i32_0 = arith.constant 0 : i32
    %c0_i32_1 = arith.constant 0 : i32
    return %c0_i32, %c0_i32_0 : i32, i32
  }
  func.func @transform_5(%arg0: i32) -> (i32, i32) {
    %c0_i32 = arith.constant 0 : i32
    %c0_i32_0 = arith.constant 0 : i32
    %c0_i32_1 = arith.constant 0 : i32
    return %c0_i32, %c0_i32_0 : i32, i32
  }
  func.func @transform_6(%arg0: i32) -> (i32, i32) {
    %c0_i32 = arith.constant 0 : i32
    %c0_i32_0 = arith.constant 0 : i32
    %c0_i32_1 = arith.constant 0 : i32
    return %c0_i32, %c0_i32_0 : i32, i32
  }
  func.func @transform_7(%arg0: i32) -> (i32, i32, i32, i32) {
    %c0_i32 = arith.constant 0 : i32
    %c0_i32_0 = arith.constant 0 : i32
    %c0_i32_1 = arith.constant 0 : i32
    %c0_i32_2 = arith.constant 0 : i32
    return %c0_i32, %arg0, %c0_i32_0, %c0_i32_1 : i32, i32, i32, i32
  }
}

</mosaic_0001>

<bundles_post_ra>
// kernel: tpu_custom_call.1
= control target key start
LH: loop header
LB: loop body
LE: loop exit
PB: predicated region body
PF: predicated region fallthrough
CT: control target
= control target key end

     0   :  { %s4090_s0 = inlined_call_operand.hbm [shape: f32[4,2,8,32], index: 0, kind: input, shape index: {}]   ;;  %s4091_s1 = inlined_call_operand.hbm [shape: f32[4,2,4,32], index: 1, kind: input, shape index: {}]   ;;  %s4092_s2 = inlined_call_operand.hbm [shape: f32[32,32], index: 2, kind: input, shape index: {}]   ;;  %s4093_s3 = inlined_call_operand.hbm [shape: f32[32,64], index: 3, kind: input, shape index: {}]   ;;  %s4094_s4 = inlined_call_operand.vmem [shape: f32[1,32], index: 4, kind: input, shape index: {}]   ;;  %s4095_s5 = inlined_call_operand.vmem [shape: f32[1,64], index: 5, kind: input, shape index: {}]   ;;  %s4096_s6 = inlined_call_operand.hbm [shape: f32[32,32], index: 6, kind: input, shape index: {}]   ;;  %s4097_s7 = inlined_call_operand.hbm [shape: f32[8,2,4,32], index: 7, kind: output, shape index: {}]  }
   0x1   :  { %4106 = sst [smem:[#allocation22_spill]] %s4090_s0 }
   0x2   :  { %4107 = sst [smem:[#allocation23_spill]] %s4092_s2 }
   0x3   :  { %4108 = sst [smem:[#allocation24_spill]] %s4093_s3 }
   0x4   :  { %12 = vsyncpa [#allocation5], 0 }
   0x5   :  { %14 = vsyncpa [#allocation5 + $0x1], 0 }
   0x6   :  { %15 = vsyncpa [#allocation8], 0 }
   0x7   :  { %17 = vsyncpa [#allocation8 + $0x1], 0 }
   0x8   :  { %18 = vsyncpa [#allocation11], 0 }
   0x9   :  { %19 = vsyncpa [#allocation6], 0 }
   0xa   :  { %21 = vsyncpa [#allocation6 + $0x1], 0  ;;  %s3415_s24 = smov 0   ;;  %s3417_s25 = smov 0  }
   0xb   :  { %s3419_s26 = smov 0   ;;  %s3421_s27 = smov 0  }
   0xc LB: > { %s3436_s28 = sadd.s32 4294967295, %s3354_s27   ;;  %s2646_s29 = sadd.s32 4294967294, %s3354_s27   ;;  %s3354_s27 = sphi %s3421_s27, %s4136_s27   ;;  %s3350_s26 = sphi %s3419_s26, %s4140_s26   ;;  %s3346_s25 = sphi %s3417_s25, %s4139_s25   ;;  %s3342_s24 = sphi %s3415_s24, %s4138_s24  }
   0xd   : > { %s3440_s30 = sadd.s32 1, %s3354_s27   ;;  %s34_s8 = sadd.s32 1, %s3350_s26 }
   0xe   : > { %4109 = sst [smem:[#allocation19_spill]] %s3440_s30  ;;  %s31_s9 = ssub.s32 %s3354_s27, %s3440_s30 }
   0xf   : > { %p41_p0 = scmp.ne.s32.totalorder %s3350_s26, %s3346_s25  ;;  %p32_p1 = scmp.eq.s32.totalorder %s31_s9, 0 }
  0x10   : > { %p42_p2 = scmp.eq.s32.totalorder %s3354_s27, 0  ;;  %p47_p3 = scmp.ne.s32.totalorder %s3346_s25, %s3342_s24 }
  0x11   : > { %p4098_p4 = scmp.eq.s32.totalorder %s3436_s28, 0  ;;  %p202_p7 = scmp.eq.s32.totalorder %s3436_s28, 1 }
  0x12   : > { %s3452_s10 = scalar_select %p32_p1, %s3350_s26, %s34_s8  }
  0x13   : > { %p3454_p5 = por %p42_p2, %p41_p0  ;;  %p3460_p6 = por %p4098_p4, %p47_p3 }
  0x14   : > { %4110 = sst [smem:[#allocation20_spill]] %s3452_s10  ;;  %p208_p8 = scmp.eq.s32.totalorder %s2646_s29, 1 }
  0x15   : > { %s4111_s11 = scalar_select %p3454_p5, 1, 0 }
  0x16   : > { %s4112_s12 = scalar_select %p3460_p6, 1, 0 }
  0x17   : > { %p2647_p9 = scmp.ge.s32.totalorder %s3354_s27, 1  ;;  %p215_p10 = scmp.lt.s32.totalorder %s3354_s27, 3 }
  0x18   : > { %p3467_p11 = por %p202_p7, %p41_p0  ;;  %p3471_p12 = por %p208_p8, %p47_p3 }
  0x19   : > { %p3475_p13 = pnand %p2647_p9, %p215_p10  ;;  %s3356_s16 = smov [#allocation9]  }
  0x1a   : > { %s4113_s13 = scalar_select %p3467_p11, 1, 0 }
  0x1b   : > { %s4114_s14 = scalar_select %p3471_p12, 1, 0 }
  0x1c   : > { %s4116_s15 = scalar_select %p3475_p13, 1, 0 }
  0x1d   : > { %4115 = sst [smem:[#allocation21_spill]] %s4114_s14  ;;  %p3045_p1 = pneg %p3475_p13 }
  0x1e   : > { %s227_s17 = sshll.u32 %s3356_s16, 4  ;;  %s3357_s19 = smov [#allocation10]   ;;  %s228_s17 = int_to_ptr.vmem [resolvable:$true] %s227_s17 }
  0x1f   : > { %p3483_p2 = pnand %p3045_p1, %p4098_p4  ;;  %s240_s20 = sshll.u32 %s3357_s19, 4  ;;  %s241_s20 = int_to_ptr.vmem [resolvable:$true] %s240_s20 }
  0x20   : > { %s4118_s2 = sld [smem:[#allocation23_spill]] }
  0x21   : > { %p3497_p8 = pneg %p3483_p2 }
  0x26   : > { %s3132_s23 = scalar_lea.hbm %s4118_s2, 512 }
  0x27   : > { %p3133_p7 = scmp.ne.s32.totalorder %s4118_s2, %s3132_s23  ;;  %p3139_p1 = scmp.lt.u32.totalorder %s3132_s23, %s4118_s2 }
  0x29   : > { %p3135_p9 = pnand %p3497_p8, %p3133_p7 }
  0x2b   : > { %p3136_p10 = pneg %p3135_p9 }
  0x2d   : > { %p3141_p0 = pnand %p3139_p1, %p3136_p10 }
  0x2f   : > { %3144 = shalt.err (!%p3141_p0)
}
  0x30   : > { %s3145_s19 = scalar_lea.vmem %s228_s17, 512  ;;  %p3153_p11 = scmp.lt.s32.totalorder %s228_s17, %s228_s17 }
  0x31   : > { %p3146_p4 = scmp.ne.s32.totalorder %s228_s17, %s3145_s19  ;;  %p3154_p6 = scmp.lt.s32.totalorder %s3145_s19, %s3145_s19 }
  0x33   : > { %p3148_p3 = pnand %p3146_p4, %p3497_p8  ;;  %p3155_p13 = por %p3154_p6, %p3153_p11 }
  0x35   : > { %p3149_p12 = pneg %p3148_p3 }
  0x37   : > { %p3156_p5 = pnand %p3155_p13, %p3149_p12 }
  0x39   : > { %3159 = shalt.err (!%p3156_p5)
}
  0x3a   : > { %s3358_s21 = smov 128   ;;  %s3359_s10 = smov 8  }
  0x3b   : > { %3048 = dma.hbm_to_vmem [thread:$0]  (!%p3483_p2), %s4118_s2, 512, %s228_s17, [#allocation8], %s3358_s21, %s3358_s21, %s3359_s10  }
  0x3c   : > { %p4120_p4 = scmp.ne.s32.totalorder %s4111_s11, 0  ;;  %p4121_p0 = scmp.lt.s32.totalorder %s3354_s27, 2 }
  0x3d   : > { %s4123_s3 = sld [smem:[#allocation24_spill]] }
  0x3e   : > { %p3520_p3 = pnand %p4121_p0, %p4120_p4 }
  0x40   : > { %s4122_s29 = scalar_select %p3520_p3, 1, 0 }
  0x43   : > { %s3160_s19 = scalar_lea.hbm %s4123_s3, 512 }
  0x44   : > { %p3161_p5 = scmp.ne.s32.totalorder %s4123_s3, %s3160_s19  ;;  %p3167_p12 = scmp.lt.u32.totalorder %s3160_s19, %s4123_s3 }
  0x46   : > { %p3163_p6 = pnand %p3161_p5, %p3497_p8 }
  0x48   : > { %p3164_p11 = pneg %p3163_p6 }
  0x4a   : > { %p3169_p13 = pnand %p3167_p12, %p3164_p11 }
  0x4c   : > { %3172 = shalt.err (!%p3169_p13)
}
  0x4d   : > { %s3173_s11 = scalar_lea.vmem %s241_s20, 512  ;;  %p3181_p1 = scmp.lt.s32.totalorder %s241_s20, %s241_s20 }
  0x4e   : > { %p3174_p7 = scmp.ne.s32.totalorder %s241_s20, %s3173_s11  ;;  %p3182_p4 = scmp.lt.s32.totalorder %s3173_s11, %s3173_s11 }
  0x50   : > { %p3176_p9 = pnand %p3174_p7, %p3497_p8  ;;  %p3183_p0 = por %p3182_p4, %p3181_p1 }
  0x52   : > { %p3177_p10 = pneg %p3176_p9 }
  0x54   : > { %p3184_p3 = pnand %p3183_p0, %p3177_p10 }
  0x56   : > { %3187 = shalt.err (!%p3184_p3)
}
  0x57   : > { %3051 = dma.hbm_to_vmem [thread:$0]  (!%p3483_p2), %s4123_s3, 512, %s241_s20, [#allocation11], %s3358_s21, %s3358_s21, %s3359_s10  }
  0x58   : > { %s3360_s23 = smov [#allocation12]   ;;  %s3546_s16 = sand.u32 1, %s3350_s26  }
  0x59   : > { %s259_s8 = sshll.u32 %s3360_s23, 4  ;;  %s3188_s17 = scalar_lea.hbm %s4096_s6, 512  ;;  %s260_s8 = int_to_ptr.vmem [resolvable:$true] %s259_s8 }
  0x5a   : > { %p3189_p3 = scmp.ne.s32.totalorder %s4096_s6, %s3188_s17  ;;  %p3195_p11 = scmp.lt.u32.totalorder %s3188_s17, %s4096_s6 }
  0x5c   : > { %p3191_p5 = pnand %p3189_p3, %p3497_p8 }
  0x5e   : > { %p3192_p6 = pneg %p3191_p5 }
  0x60   : > { %p3197_p12 = pnand %p3195_p11, %p3192_p6 }
  0x62   : > { %3200 = shalt.err (!%p3197_p12)
}
  0x63   : > { %s3201_s20 = scalar_lea.vmem %s260_s8, 512  ;;  %p3209_p10 = scmp.lt.s32.totalorder %s260_s8, %s260_s8 }
  0x64   : > { %p3202_p13 = scmp.ne.s32.totalorder %s260_s8, %s3201_s20  ;;  %p3210_p1 = scmp.lt.s32.totalorder %s3201_s20, %s3201_s20 }
  0x66   : > { %p3204_p7 = pnand %p3202_p13, %p3497_p8  ;;  %p3211_p4 = por %p3210_p1, %p3209_p10 }
  0x68   : > { %p3205_p9 = pneg %p3204_p7 }
  0x6a   : > { %p3212_p0 = pnand %p3211_p4, %p3205_p9 }
  0x6c   : > { %3215 = shalt.err (!%p3212_p0)
}
  0x6d   : > { %3054 = dma.hbm_to_vmem [thread:$0]  (!%p3483_p2), %s4096_s6, 512, %s260_s8, [#allocation11], %s3358_s21, %s3358_s21, %s3359_s10  }
  0x6e   : > { %s2652_s9 = sshll.u32 %s3546_s16, 5  ;;  %s2653_s19 = sshll.u32 %s3354_s27, 7 }
  0x6f   : > { %s4124_s0 = sld [smem:[#allocation22_spill]]  ;;  %s277_s18 = scalar_lea.vmem [#allocation4], %s2652_s9 }
  0x70   : > { %s283_s30 = sshll.u32 %s277_s18, 4  ;;  %s293_s14 = sand.u32 1, %s3354_s27   ;;  %s3576_s30 = int_to_ptr.vmem [resolvable:$true] %s283_s30 }
  0x71   : > { %s274_s20 = scalar_lea.sflag [#allocation5], %s3546_s16  ;;  %p4125_p2 = scmp.ne.s32.totalorder %s4122_s29, 0 }
  0x73   : > { %p3218_p3 = pneg %p4125_p2 }
  0x75   : > { %s3574_s11 = scalar_lea.hbm %s4124_s0, %s2653_s19  ;;  %s3221_s19 = scalar_lea.hbm %s4124_s0, 1024 }
  0x76   : > { %s3216_s2 = scalar_lea.hbm %s3574_s11, 512  ;;  %p3222_p11 = scmp.lt.u32.totalorder %s3574_s11, %s4124_s0 }
  0x77   : > { %p3217_p8 = scmp.ne.s32.totalorder %s3574_s11, %s3216_s2  ;;  %p3223_p12 = scmp.lt.u32.totalorder %s3221_s19, %s3216_s2 }
  0x78   : > { %p3225_p7 = scmp.lt.u32.totalorder %s3216_s2, %s3574_s11 }
  0x79   : > { %p3219_p5 = pnand %p3218_p3, %p3217_p8  ;;  %p3224_p13 = por %p3223_p12, %p3222_p11 }
  0x7b   : > { %p3220_p6 = pneg %p3219_p5  ;;  %p3226_p9 = por %p3225_p7, %p3224_p13 }
  0x7d   : > { %p3227_p10 = pnand %p3226_p9, %p3220_p6 }
  0x7f   : > { %3230 = shalt.err (!%p3227_p10)
}
  0x80   : > { %s3231_s9 = scalar_lea.vmem %s3576_s30, 512  ;;  %s3361_s18 = smov [#allocation4]  }
  0x81   : > { %p3232_p1 = scmp.ne.s32.totalorder %s3576_s30, %s3231_s9  ;;  %s3236_s8 = sshll.u32 %s3361_s18, 4  ;;  %s3237_s8 = int_to_ptr.vmem [resolvable:$false] %s3236_s8 }
  0x82   : > { %s3238_s23 = scalar_lea.vmem %s3237_s8, 1024  ;;  %p3239_p8 = scmp.lt.s32.totalorder %s3576_s30, %s3237_s8 }
  0x83   : > { %p3234_p4 = pnand %p3232_p1, %p3218_p3  ;;  %p3240_p5 = scmp.lt.s32.totalorder %s3238_s23, %s3231_s9 }
  0x85   : > { %p3235_p0 = pneg %p3234_p4  ;;  %p3241_p11 = por %p3240_p5, %p3239_p8 }
  0x87   : > { %p3242_p12 = pnand %p3241_p11, %p3235_p0 }
  0x89   : > { %3245 = shalt.err (!%p3242_p12)
}
  0x8a   : > { %s3362_s2 = smov 256   ;;  %s2654_s19 = sshll.u32 %s3546_s16, 4 }
  0x8b   : > { %3058 = dma.hbm_to_vmem [thread:$0]  (!%p4125_p2), %s3574_s11, 512, %s3576_s30, %s274_s20, %s3362_s2, %s3358_s21, %s3359_s10  }
  0x8c   : > { %s2655_s22 = sshll.u32 %s3354_s27, 6  ;;  %s297_s8 = scalar_lea.vmem [#allocation7], %s2654_s19 }
  0x8d   : > { %s3614_s18 = scalar_lea.hbm %s4091_s1, %s2655_s22  ;;  %s303_s23 = sshll.u32 %s297_s8, 4  ;;  %s3616_s23 = int_to_ptr.vmem [resolvable:$true] %s303_s23 }
  0x8e   : > { %s3620_s0 = scalar_lea.sflag [#allocation8], %s293_s14  ;;  %s3246_s3 = scalar_lea.hbm %s3614_s18, 256 }
  0x8f   : > { %p3247_p6 = scmp.ne.s32.totalorder %s3614_s18, %s3246_s3  ;;  %s3251_s11 = scalar_lea.hbm %s4091_s1, 512 }
  0x90   : > { %p3252_p9 = scmp.lt.u32.totalorder %s3614_s18, %s4091_s1  ;;  %p3253_p10 = scmp.lt.u32.totalorder %s3251_s11, %s3246_s3 }
  0x91   : > { %p3249_p13 = pnand %p3247_p6, %p3218_p3  ;;  %p3255_p4 = scmp.lt.u32.totalorder %s3246_s3, %s3614_s18 }
  0x92   : > { %p3254_p1 = por %p3253_p10, %p3252_p9 }
  0x93   : > { %p3250_p7 = pneg %p3249_p13 }
  0x94   : > { %p3256_p0 = por %p3255_p4, %p3254_p1 }
  0x96   : > { %p3257_p8 = pnand %p3256_p0, %p3250_p7 }
  0x98   : > { %3260 = shalt.err (!%p3257_p8)
}
  0x99   : > { %s3261_s14 = scalar_lea.vmem %s3616_s23, 256  ;;  %s3363_s2 = smov [#allocation7]  }
  0x9a   : > { %p3262_p5 = scmp.ne.s32.totalorder %s3616_s23, %s3261_s14  ;;  %s3266_s19 = sshll.u32 %s3363_s2, 4  ;;  %s3267_s19 = int_to_ptr.vmem [resolvable:$false] %s3266_s19 }
  0x9b   : > { %s3268_s22 = scalar_lea.vmem %s3267_s19, 512  ;;  %p3269_p6 = scmp.lt.s32.totalorder %s3616_s23, %s3267_s19 }
  0x9c   : > { %p3264_p11 = pnand %p3262_p5, %p3218_p3  ;;  %p3270_p13 = scmp.lt.s32.totalorder %s3268_s22, %s3261_s14 }
  0x9e   : > { %p3265_p12 = pneg %p3264_p11  ;;  %p3271_p9 = por %p3270_p13, %p3269_p6 }
  0xa0   : > { %p3272_p10 = pnand %p3271_p9, %p3265_p12 }
  0xa2   : > { %3275 = shalt.err (!%p3272_p10)
}
  0xa3   : > { %s3364_s3 = smov 64   ;;  %s3365_s17 = smov 4  }
  0xa4   : > { %3061 = dma.hbm_to_vmem [thread:$0]  (!%p4125_p2), %s3614_s18, 256, %s3616_s23, %s3620_s0, %s3358_s21, %s3364_s3, %s3365_s17  }
  0xa5   : > { %p4126_p3 = scmp.ne.s32.totalorder %s4116_s15, 0 }
  0xa6   : > { %s3650_s9 = sand.u32 (!%p4126_p3), 1, %s3346_s25   ;;  %p4127_p7 = scmp.ne.s32.totalorder (!%p4126_p3), %s4112_s12, 0 }
  0xa7   : > { %315 = sbr.rel (%p4126_p3) target bundleno = 1731 (0x6c3), region = 48  ;;  %s2657_s8 = sshll.u32 (!%p4126_p3), %s3650_s9, 5 }
  0xa8   : > { %s318_s10 = scalar_lea.sflag (!%p4126_p3), [#allocation5], %s3650_s9  ;;  %s3656_s16 = scalar_lea.vmem (!%p4126_p3), [#allocation4], %s2657_s8 }
  0xae   : > { %3321 = dma.done.wait (%p4127_p7), %s318_s10, 512  }
  0xaf   : > { %3323 = vsyncadd (%p4127_p7), %s318_s10, 4294966784  ;;  %s326_s0 = sand.u32 1, %s3436_s28   ;;  %s2658_s15 = sshll.u32 %s3650_s9, 4 }
  0xb0   : > { %s327_s21 = scalar_lea.sflag [#allocation8], %s326_s0  ;;  %s3664_s29 = scalar_lea.vmem [#allocation7], %s2658_s15 }
  0xb1   : > { %3325 = dma.done.wait (%p4127_p7), %s327_s21, 256  }
  0xb2   : > { %3327 = vsyncadd (%p4127_p7), %s327_s21, 4294967040  ;;  %p4128_p2 = scmp.eq.s32.totalorder %s3436_s28, 0 }
  0xb4   : > { %3329 = dma.done.wait (%p4128_p2), [#allocation8], 512   ;;  %p4129_p1 = pmov %p4128_p2 }
  0xb6   : > { %3331 = vsyncadd (%p4129_p1), [#allocation8], 4294966784  ;;  %p4130_p4 = pmov %p4129_p1 }
  0xb7   : > { %p4131_p0 = pmov %p4129_p1 }
  0xb8   : > { %3333 = dma.done.wait (%p4130_p4), [#allocation11], 1024  }
  0xb9   : > { %3335 = vsyncadd (%p4131_p0), [#allocation11], 4294966272  ;;  %v3366_v0 = vmov 0.0|0.0   ;;  %vm3367_vm0 = vmmov 0   ;;  %v3368_v1 = vmov 0.0   ;;  %v382_v2 = vld [vmem:[#allocation10] sm:$0xff]  ;;  %v477_v14 = vlaneseq }
  0xba   : > { %2955 = vmatprep.subr.bf16.mxu0 %v3366_v0  ;;  %2961 = vmatprep.subr.bf16.mxu1 %v3366_v0  ;;  %v383_v3 = vld [vmem:[#allocation10 + $0x8] sm:$0xff]  ;;  %v384_v4 = vld [vmem:[#allocation10 + $0x10] sm:$0xff]  ;;  %v385_v6 = vld [vmem:[#allocation10 + $0x18] sm:$0xff]  ;;  %vm399_vm1 = vcmask 261120   ;;  %v3369_v12 = vmov 1966171168  }
  0xbb   : > { %2799 = vmatprep.mubr.msk.f32.mxu0 %vm3367_vm0, %v3368_v1  ;;  %2810 = vmatprep.mubr.msk.f32.mxu1 %vm3367_vm0, %v3368_v1  ;;  %v2956_v5 = vpack.c.bf16 %v383_v3, %v382_v2  ;;  %v2959_v7 = vpack.c.bf16 %v385_v6, %v384_v4  ;;  %v392_v8 = vld [vmem:[%s3664_s29] sm:$0xf]  ;;  %v2666_v9 = vld [vmem:[%s3664_s29 + $0x4] sm:$0xf]  ;;  %v2669_v10 = vld [vmem:[%s3664_s29 + $0x8] sm:$0xf]  ;;  %v475_v13 = vunpack.c.l.s4 %v3369_v12 }
  0xbc   : > { %v2672_v11 = vld [vmem:[%s3664_s29 + $0xc] sm:$0xf]  ;;  %v478_v16 = vshrl.u32 %v477_v14, 7  ;;  %v2663_v17 = vld [vmem:[%s4095_s5] ss:$0 sm:$0xff]  ;;  %vm502_vm2 = vcmask 253952  }
  0xbd   : > { %2957 = vmatpush3.bf16.msra.mxu0 %v2956_v5  ;;  %2963 = vmatpush3.bf16.msra.mxu1 %v2956_v5  ;;  %v476_v15 = vunpack.c.0.s8 %v475_v13  ;;  %s3370_s23 = smov 96   ;;  %vm1202_vm7 = vcmask 31744   ;;  %vm1215_vm8 = vcmask 1043456   ;;  %s3906_s20 = scalar_lea.vmem [#allocation13], %s2657_s8 }
  0xbe   : > { %2958 = vmatprep.subr.bf16.mxu0 %v3366_v0  ;;  %2964 = vmatprep.subr.bf16.mxu1 %v3366_v0  ;;  %v3736_v58 = vsub.s32 0, %v478_v16  ;;  %s2708_s14 = sshll.u32 %s3436_s28, 6  ;;  %s2522_s2 = sshll.u32 %s3906_s20, 4  ;;  %s4038_s2 = int_to_ptr.vmem [resolvable:$true] %s2522_s2 }
  0xbf   : > { %v3708_v18 = vsub.s32 %v476_v15, %v478_v16  ;;  %s4036_s22 = scalar_lea.hbm %s4097_s7, %s2708_s14  ;;  %s2510_s3 = scalar_lea.sflag [#allocation6], %s3650_s9 }
  0xc0   : > { %s3276_s17 = scalar_lea.vmem %s4038_s2, 512  ;;  %p4132_p5 = scmp.ne.s32.totalorder %s4113_s13, 0 }
  0xc1   : > { %2960 = vmatpush3.bf16.msra.mxu0 %v2959_v7  ;;  %2966 = vmatpush3.bf16.msra.mxu1 %v2959_v7  ;;  %p3277_p8 = scmp.ne.s32.totalorder %s4038_s2, %s3276_s17  ;;  %s3371_s8 = smov [#allocation13]  }
  0xc2   : > { %2967 = vmatprep.subr.bf16.mxu0 %v3366_v0  ;;  %2973 = vmatprep.subr.bf16.mxu1 %v3366_v0  ;;  %s3280_s10 = sshll.u32 %s3371_s8, 4  ;;  %s3281_s10 = int_to_ptr.vmem [resolvable:$false] %s3280_s10 }
  0xc3   : > { %p3278_p11 = pnand %p3277_p8, %p4132_p5  ;;  %p3283_p6 = scmp.lt.s32.totalorder %s4038_s2, %s3281_s10 }
  0xc4   : > { %2800 = vmatmul.mubr.msk.f32.vlgmr.msra.gmra.mrb[0].mxu0 %vm399_vm1, %v392_v8  ;;  %2811 = vmatmul.mubr.msk.f32.vlgmr.msra.gmra.mrb[0].mxu1 %vm399_vm1, %v2666_v9 }
  0xc5   : > { %2969 = vmatpush3.bf16.msra.mxu0 %v2956_v5  ;;  %2975 = vmatpush3.bf16.msra.mxu1 %v2956_v5  ;;  %p3279_p12 = pneg %p3278_p11 }
  0xc6   : > { %2970 = vmatprep.subr.bf16.mxu0 %v3366_v0  ;;  %2976 = vmatprep.subr.bf16.mxu1 %v3366_v0 }
  0xc7   : > { %2821 = vmatprep.mubr.msk.f32.mxu0 %vm3367_vm0, %v3368_v1  ;;  %2832 = vmatprep.mubr.msk.f32.mxu1 %vm3367_vm0, %v3368_v1 }
  0xc9   : > { %2972 = vmatpush3.bf16.msra.mxu0 %v2959_v7  ;;  %2978 = vmatpush3.bf16.msra.mxu1 %v2959_v7 }
  0xca   : > { %2979 = vmatprep.subr.bf16.mxu0 %v3366_v0 }
  0xcc   : > { %2822 = vmatmul.mubr.msk.f32.vlgmr.msra.gmra.mrb[2].mxu0 %vm399_vm1, %v2669_v10  ;;  %2833 = vmatmul.mubr.msk.f32.vlgmr.msra.gmra.mrb[2].mxu1 %vm399_vm1, %v2672_v11 }
  0xcd   : > { %2843 = vmatprep.mubr.msk.f32.mxu0 %vm3367_vm0, %v3368_v1 }
 0x197   : > { %v469_v19 = vpop.f32.mrb[0].mxu0  ;;  %v642_v20 = vpop.f32.mrb[0].mxu1 }
 0x198   : > { %v470_v21 = vadd.f32 %v2663_v17, %v469_v19  ;;  %v2801_v22 = vpop.f32.mrb[1].mxu0  ;;  %v643_v23 = vadd.f32 %v2663_v17, %v642_v20  ;;  %v2812_v24 = vpop.f32.mrb[1].mxu1 }
 0x19a   : > { %v480_v25 = vrot.slane %v470_v21, %v3708_v18  ;;  %v507_v26 = vmul.f32 0.5, %v470_v21  ;;  %v653_v27 = vrot.slane %v643_v23, %v3708_v18 }
 0x19c   : > { %v481_v28 = vcombine.high %v480_v25, %v480_v25  ;;  %v488_v29 = vrot.slane %v480_v25, %v3708_v18  ;;  %vm509_vm3 = vcmp.ge.f32.partialorder %v507_v26, 0.5  ;;  %v654_v30 = vcombine.high %v653_v27, %v653_v27 }
 0x19d   : > { %v2665_v31 = vsel %vm509_vm3, 1.0, %v3368_v1  ;;  %v661_v32 = vrot.slane %v653_v27, %v3708_v18 }
 0x19e   : > { %v495_v33 = vrot.slane %v481_v28, %v3708_v18  ;;  %v496_v34 = vcombine.high %v488_v29, %v488_v29  ;;  %503 = vst.msk [vmem:[#allocation2] sm:$0x1] %vm502_vm2, %v488_v29  ;;  %v521_v35 = vrot.slane %v2665_v31, %v3708_v18  ;;  %v512_v36 = vsub.f32 1.0, %v2665_v31 }
 0x19f   : > { %v668_v37 = vrot.slane %v654_v30, %v3708_v18  ;;  %v669_v38 = vcombine.high %v661_v32, %v661_v32  ;;  %675 = vst.msk [vmem:[#allocation2 + $0x1] sm:$0x1] %vm502_vm2, %v661_v32  ;;  %v815_v39 = vpop.f32.mrb[2].mxu0  ;;  %v988_v40 = vpop.f32.mrb[2].mxu1 }
 0x1a0   : > { %v497_v41 = vcombine.high %v495_v33, %v495_v33  ;;  %504 = vst.msk [vmem:[#allocation2 + $0x4] sm:$0x1] %vm502_vm2, %v495_v33  ;;  %505 = vst.msk [vmem:[#allocation2 + $0x8] sm:$0x1] %vm502_vm2, %v496_v34  ;;  %v513_v42 = vmul.f32 %v512_v36, %v507_v26  ;;  %v816_v43 = vadd.f32 %v2663_v17, %v815_v39  ;;  %v2823_v45 = vpop.f32.mrb[3].mxu0  ;;  %v2834_v46 = vpop.f32.mrb[3].mxu1 }
 0x1a1   : > { %v3722_v44 = vadd.f32 %v2663_v17, %v988_v40  ;;  %v670_v47 = vcombine.high %v668_v37, %v668_v37  ;;  %676 = vst.msk [vmem:[#allocation2 + $0x5] sm:$0x1] %vm502_vm2, %v668_v37  ;;  %677 = vst.msk [vmem:[#allocation2 + $0x9] sm:$0x1] %vm502_vm2, %v669_v38  ;;  %v522_v48 = vcombine.high %v521_v35, %v521_v35 }
 0x1a2   : > { %506 = vst.msk [vmem:[#allocation2 + $0xc] sm:$0x1] %vm502_vm2, %v497_v41  ;;  %v679_v49 = vsub.f32 %v643_v23, %v513_v42  ;;  %v826_v50 = vrot.slane %v816_v43, %v3708_v18  ;;  %v3753_v7 = vrot.slane %v521_v35, %v3708_v18 }
 0x1a3   : > { %v999_v51 = vrot.slane %v3722_v44, %v3708_v18  ;;  %678 = vst.msk [vmem:[#allocation2 + $0xd] sm:$0x1] %vm502_vm2, %v670_v47  ;;  %v3732_v52 = vrot.slane %v522_v48, %v3708_v18  ;;  %v378_v47 = vld [vmem:[#allocation9] sm:$0xff]  ;;  %v379_v48 = vld [vmem:[#allocation9 + $0x8] sm:$0xff] }
 0x1a4   : > { %v680_v53 = vmul.f32 0.5, %v679_v49  ;;  %v827_v54 = vcombine.high %v826_v50, %v826_v50  ;;  %v834_v55 = vrot.slane %v826_v50, %v3708_v18  ;;  %v542_v13 = vrot.slane %v3753_v7, %v3736_v58 }
 0x1a5   : > { %v1000_v56 = vcombine.high %v999_v51, %v999_v51  ;;  %v1007_v57 = vrot.slane %v999_v51, %v3708_v18  ;;  %v538_v59 = vcombine.high %v3732_v52, %v3732_v52  ;;  %v3784_v50 = vpack.c.bf16 %v379_v48, %v378_v47  ;;  %v3868_v47 = vld [vmem:[#allocation12 + $0x18] sm:$0xff]  ;;  %v3870_v48 = vld [vmem:[#allocation12 + $0x10] sm:$0xff] }
 0x1a6   : > { %v681_v60 = vadd.f32 %v680_v53, %v513_v42  ;;  %v841_v61 = vrot.slane %v827_v54, %v3708_v18  ;;  %v842_v62 = vcombine.high %v834_v55, %v834_v55  ;;  %848 = vst.msk [vmem:[#allocation2 + $0x2] sm:$0x1] %vm502_vm2, %v834_v55  ;;  %v380_v53 = vld [vmem:[#allocation9 + $0x10] sm:$0xff]  ;;  %v381_v54 = vld [vmem:[#allocation9 + $0x18] sm:$0xff] }
 0x1a7   : > { %v1014_v63 = vrot.slane %v1000_v56, %v3708_v18  ;;  %v1015_v2 = vcombine.high %v1007_v57, %v1007_v57  ;;  %1021 = vst.msk [vmem:[#allocation2 + $0x3] sm:$0x1] %vm502_vm2, %v1007_v57  ;;  %v3745_v3 = vrot.slane %v538_v59, %v3736_v58  ;;  %2981 = vmatpush3.bf16.msra.mxu0 %v3784_v50  ;;  %v1088_v57 = vld [vmem:[%s3656_s16] sm:$0xff] }
 0x1a8   : > { %vm682_vm4 = vcmp.ge.f32.partialorder %v681_v60, 0.5  ;;  %v843_v4 = vcombine.high %v841_v61, %v841_v61  ;;  %849 = vst.msk [vmem:[#allocation2 + $0x6] sm:$0x1] %vm502_vm2, %v841_v61  ;;  %850 = vst.msk [vmem:[#allocation2 + $0xa] sm:$0x1] %vm502_vm2, %v842_v62  ;;  %2982 = vmatprep.subr.bf16.mxu0 %v3366_v0  ;;  %v3790_v55 = vpack.c.bf16 %v381_v54, %v380_v53 }
 0x1a9   : > { %v1016_v5 = vcombine.high %v1014_v63, %v1014_v63  ;;  %1022 = vst.msk [vmem:[#allocation2 + $0x7] sm:$0x1] %vm502_vm2, %v1014_v63  ;;  %v2668_v6 = vsel %vm682_vm4, 1.0, %v3368_v1  ;;  %1023 = vst.msk [vmem:[#allocation2 + $0xb] sm:$0x1] %vm502_vm2, %v1015_v2  ;;  %v537_v61 = vcombine.high %v3753_v7, %v3753_v7 }
 0x1aa   : > { %v685_v8 = vsub.f32 1.0, %v2668_v6  ;;  %851 = vst.msk [vmem:[#allocation2 + $0xe] sm:$0x1] %vm502_vm2, %v843_v4  ;;  %v694_v9 = vrot.slane %v2668_v6, %v3708_v18 }
 0x1ab   : > { %1024 = vst.msk [vmem:[#allocation2 + $0xf] sm:$0x1] %vm502_vm2, %v1016_v5  ;;  %2984 = vmatpush3.bf16.msra.mxu0 %v3790_v55  ;;  %v550_v62 = vrot.slane %v537_v61, %v3736_v58 }
 0x1ac   : > { %v686_v10 = vmul.f32 %v685_v8, %v681_v60  ;;  %v702_v11 = vrot.slane %v694_v9, %v3708_v18  ;;  %v695_v12 = vcombine.high %v694_v9, %v694_v9  ;;  %2991 = vmatprep.subr.bf16.mxu0 %v3366_v0  ;;  %v546_v60 = vrot.slane %v3732_v52, %v3736_v58 }
 0x1ae   : > { %v852_v14 = vsub.f32 %v816_v43, %v686_v10  ;;  %v1168_v15 = vld [vmem:[#allocation2] sm:$0xf]  ;;  %v715_v16 = vrot.slane %v702_v11, %v3736_v58  ;;  %v709_v17 = vrot.slane %v695_v12, %v3708_v18  ;;  %v710_v19 = vcombine.high %v702_v11, %v702_v11  ;;  %2844 = vmatmul.mubr.msk.f32.vlgmr.msra.gmra.mrb[4].mxu0 %vm399_vm1, %v1088_v57 }
 0x1af   : > { %1170 = vxpose.xlu1.b32.start.end [1/1] (short) (narrow) %v1168_v15, 32  ;;  %2993 = vmatpush3.bf16.msra.mxu0 %v3784_v50  ;;  %v3877_v57 = vld [vmem:[%s4094_s4] ss:$0 sm:$0xff] }
 0x1b0   : > { %v853_v20 = vmul.f32 0.5, %v852_v14  ;;  %v3122_v21 = vpack.i.bf16 %v715_v16, %v542_v13  ;;  %v3764_v22 = vrot.slane %v710_v19, %v3736_v58  ;;  %v711_v23 = vcombine.high %v709_v17, %v709_v17  ;;  %2873 = vmatprep.mubr.msk.f32.mxu0 %vm3367_vm0, %v3368_v1  ;;  %2994 = vmatprep.subr.bf16.mxu0 %v3366_v0  ;;  %v1523_v5 = vld [vmem:[#allocation2 + $0x4] sm:$0xf]  ;;  %v1877_v6 = vld [vmem:[#allocation2 + $0x8] sm:$0xf] }
 0x1b1   : > { %v719_v51 = vrot.slane %v709_v17, %v3736_v58 }
 0x1b2   : > { %v854_v24 = vadd.f32 %v853_v20, %v686_v10  ;;  %3123 = vrot.lane.b32.xlu0 %v3122_v21, %s3370_s23  ;;  %v3768_v25 = vrot.slane %v711_v23, %v3736_v58 }
 0x1b3   : > { %2996 = vmatpush3.bf16.msra.mxu0 %v3790_v55 }
 0x1b4   : > { %vm855_vm5 = vcmp.ge.f32.partialorder %v854_v24, 0.5  ;;  %2997 = vmatprep.subr.bf16.mxu0 %v3366_v0 }
 0x1b5   : > { %v2671_v26 = vsel %vm855_vm5, 1.0, %v3368_v1 }
 0x1b6   : > { %v858_v27 = vsub.f32 1.0, %v2671_v26  ;;  %v867_v28 = vrot.slane %v2671_v26, %v3708_v18 }
 0x1b8   : > { %v859_v29 = vmul.f32 %v858_v27, %v854_v24  ;;  %v868_v30 = vcombine.high %v867_v28, %v867_v28  ;;  %v875_v39 = vrot.slane %v867_v28, %v3708_v18 }
 0x1ba   : > { %v1025_v31 = vsub.f32 %v3722_v44, %v859_v29  ;;  %v882_v32 = vrot.slane %v868_v30, %v3708_v18  ;;  %v888_v42 = vrot.slane %v875_v39, %v3736_v58  ;;  %v883_v63 = vcombine.high %v875_v39, %v875_v39 }
 0x1bc   : > { %v1026_v33 = vmul.f32 0.5, %v1025_v31  ;;  %v884_v34 = vcombine.high %v882_v32, %v882_v32  ;;  %v892_v56 = vrot.slane %v882_v32, %v3736_v58  ;;  %v896_v2 = vrot.slane %v883_v63, %v3736_v58 }
 0x1be   : > { %v1027_v35 = vadd.f32 %v1026_v33, %v859_v29  ;;  %v900_v36 = vrot.slane %v884_v34, %v3736_v58 }
 0x1c0   : > { %vm1028_vm6 = vcmp.ge.f32.partialorder %v1027_v35, 0.5 }
 0x1c1   : > { %v2674_v37 = vsel %vm1028_vm6, 1.0, %v3368_v1 }
 0x1c2   : > { %v1038_v38 = vrot.slane %v2674_v37, %v3708_v18 }
 0x1c4   : > { %v1046_v40 = vrot.slane %v1038_v38, %v3708_v18  ;;  %v1039_v41 = vcombine.high %v1038_v38, %v1038_v38 }
 0x1c6   : > { %v1059_v43 = vrot.slane %v1046_v40, %v3736_v58  ;;  %v1053_v44 = vrot.slane %v1039_v41, %v3708_v18  ;;  %v1054_v4 = vcombine.high %v1046_v40, %v1046_v40  ;;  %v2683_v40 = vld [vmem:[%s3656_s16 + $0x8] sm:$0xff] }
 0x1c7   : > { %2874 = vmatmul.mubr.msk.f32.vlgmr.msra.gmra.mrb[6].mxu0 %vm399_vm1, %v2683_v40  ;;  %v3862_v41 = vld [vmem:[#allocation12 + $0x8] sm:$0xff] }
 0x1c8   : > { %v3127_v45 = vpack.i.bf16 %v1059_v43, %v888_v42  ;;  %v1055_v46 = vcombine.high %v1053_v44, %v1053_v44  ;;  %v1063_v59 = vrot.slane %v1053_v44, %v3736_v58  ;;  %v1067_v52 = vrot.slane %v1054_v4, %v3736_v58  ;;  %2892 = vmatprep.mubr.msk.f32.mxu0 %vm3367_vm0, %v3368_v1  ;;  %v3864_v42 = vld [vmem:[#allocation12] sm:$0xff] }
 0x1ca   : > { %3128 = vrot.lane.b32.xlu0 %v3127_v45, %s3370_s23  ;;  %v1071_v49 = vrot.slane %v1055_v46, %v3736_v58 }
 0x1ce   : > { %730 = vrot.lane.b32.xlu0 %v719_v51, %s3370_s23 }
 0x1d2   : > { %903 = vrot.lane.b32.xlu0 %v892_v56, %s3370_s23 }
 0x1d6   : > { %1074 = vrot.lane.b32.xlu0 %v1063_v59, %s3370_s23 }
 0x1d9   : > { %557 = vrot.lane.b32.xlu1 %v546_v60, %s3370_s23 }
 0x1dd   : > { %559 = vrot.lane.b32.xlu1 %v550_v62, %s3370_s23 }
 0x1e1   : > { %905 = vrot.lane.b32.xlu1 %v896_v2, %s3370_s23  ;;  %v2691_v2 = vld [vmem:[%s3656_s16 + $0x10] sm:$0xff] }
 0x1e5   : > { %1076 = vrot.lane.b32.xlu1 %v1067_v52, %s3370_s23 }
 0x1f4   : > { %1526 = vxpose.xlu0.b32.start.end [1/1] (short) (narrow) %v1523_v5, 32 }
 0x20e   : > { %1880 = vxpose.xlu1.b32.start.end [1/1] (short) (narrow) %v1877_v6, 32 }
 0x224   : > { %v3124_v7 = vpop.permute.xlu0 %3123 }
 0x225   : > { %v3126_v8 = vunpack.i.h.bf16 %v3124_v7  ;;  %v3125_v9 = vunpack.i.l.bf16 %v3124_v7 }
 0x227   : > { %740 = vst.msk [vmem:[#allocation3 + $0x1] sm:$0x1] %vm502_vm2, %v3126_v8  ;;  %567 = vst.msk [vmem:[#allocation3] sm:$0x1] %vm502_vm2, %v3125_v9 }
 0x229   : > { %732 = vrot.lane.b32.xlu0 %v3764_v22, %s3370_s23  ;;  %v2231_v22 = vld [vmem:[#allocation2 + $0xc] sm:$0xf] }
 0x22d   : > { %734 = vrot.lane.b32.xlu0 %v3768_v25, %s3370_s23 }
 0x22f   : > { %v1186_v58 = vpop.trf.xlu1 }
 0x230   : > { %2848 = vmatprep.mubr.msk.f32.mxu1 %vm1202_vm7, %v1186_v58 }
 0x231   : > { %907 = vrot.lane.b32.xlu0 %v900_v36, %s3370_s23 }
 0x233   : > { %v1187_v10 = vpop.trf.xlu1 }
 0x235   : > { %1078 = vrot.lane.b32.xlu0 %v1071_v49, %s3370_s23 }
 0x237   : > { %v1188_v14 = vpop.trf.xlu1 }
 0x238   : > { %561 = vrot.lane.b32.xlu1 %v3745_v3, %s3370_s23 }
 0x23b   : > { %v1189_v17 = vpop.trf.xlu1 }
 0x23c   : > { %v3129_v11 = vpop.permute.xlu0 %3128 }
 0x23d   : > { %v3131_v12 = vunpack.i.h.bf16 %v3129_v11  ;;  %v3130_v13 = vunpack.i.l.bf16 %v3129_v11 }
 0x23f   : > { %1084 = vst.msk [vmem:[#allocation3 + $0x3] sm:$0x1] %vm502_vm2, %v3131_v12  ;;  %913 = vst.msk [vmem:[#allocation3 + $0x2] sm:$0x1] %vm502_vm2, %v3130_v13 }
 0x240   : > { %v731_v15 = vpop.permute.xlu0 %730 }
 0x241   : > { %741 = vst.msk [vmem:[#allocation3 + $0x5] sm:$0x1] %vm502_vm2, %v731_v15 }
 0x244   : > { %v904_v16 = vpop.permute.xlu0 %903 }
 0x245   : > { %914 = vst.msk [vmem:[#allocation3 + $0x6] sm:$0x1] %vm502_vm2, %v904_v16 }
 0x246   : > { %v1169_v19 = vld [vmem:[#allocation3] sm:$0xf] }
 0x247   : > { %2846 = vmatprep.subr.msk.mxu1 %vm1215_vm8, %v1169_v19 }
 0x248   : > { %2847 = vmatpush3.msk.msra.mxu1 %vm1215_vm8, %v1169_v19  ;;  %v1075_v3 = vpop.permute.xlu0 %1074 }
 0x249   : > { %1085 = vst.msk [vmem:[#allocation3 + $0x7] sm:$0x1] %vm502_vm2, %v1075_v3  ;;  %2849 = vmatmul.mubr.msk.f32.vlgmr.msra.gmra.mrb[4].mxu1 %vm1202_vm7, %v1187_v10  ;;  %2985 = vmatprep.subr.bf16.mxu1 %v3366_v0 }
 0x24a   : > { %2851 = vmatprep.mubr.msk.f32.mxu1 %vm1202_vm7, %v1188_v14 }
 0x24b   : > { %v558_v20 = vpop.permute.xlu1 %557 }
 0x24c   : > { %568 = vst.msk [vmem:[#allocation3 + $0x4] sm:$0x1] %vm502_vm2, %v558_v20 }
 0x24d   : > { %2852 = vmatmul.mubr.msk.f32.gmra.mrb[6].mxu1 %vm1202_vm7, %v1189_v17 }
 0x24e   : > { %2862 = vmatprep.mubr.msk.f32.mxu1 %vm3367_vm0, %v3368_v1 }
 0x24f   : > { %v560_v21 = vpop.permute.xlu1 %559 }
 0x250   : > { %569 = vst.msk [vmem:[#allocation3 + $0x8] sm:$0x1] %vm502_vm2, %v560_v21 }
 0x253   : > { %v906_v23 = vpop.permute.xlu1 %905  ;;  %2234 = vxpose.xlu0.b32.start.end [1/1] (short) (narrow) %v2231_v22, 32  ;;  %v1525_v61 = vld [vmem:[#allocation3 + $0x4] sm:$0xf] }
 0x254   : > { %915 = vst.msk [vmem:[#allocation3 + $0xa] sm:$0x1] %vm502_vm2, %v906_v23 }
 0x257   : > { %v1077_v24 = vpop.permute.xlu1 %1076 }
 0x258   : > { %1086 = vst.msk [vmem:[#allocation3 + $0xb] sm:$0x1] %vm502_vm2, %v1077_v24 }
 0x274   : > { %v1542_v25 = vpop.trf.xlu0 }
 0x278   : > { %v1543_v26 = vpop.trf.xlu0 }
 0x27c   : > { %v1544_v27 = vpop.trf.xlu0 }
 0x280   : > { %v1545_v29 = vpop.trf.xlu0 }
 0x281   : > { %v1164_v36 = vpop.f32.mrb[4].mxu0 }
 0x282   : > { %v2845_v38 = vpop.f32.mrb[5].mxu0  ;;  %v1165_v60 = vadd.f32 %v3877_v57, %v1164_v36 }
 0x28e   : > { %v3845_v28 = vpop.trf.xlu1 }
 0x292   : > { %v3847_v30 = vpop.trf.xlu1 }
 0x296   : > { %v3850_v32 = vpop.trf.xlu1 }
 0x29a   : > { %v3854_v35 = vpop.trf.xlu1  ;;  %v1518_v62 = vpop.f32.mrb[6].mxu0 }
 0x29b   : > { %v733_v31 = vpop.permute.xlu0 %732  ;;  %v2875_v63 = vpop.f32.mrb[7].mxu0 }
 0x29c   : > { %742 = vst.msk [vmem:[#allocation3 + $0x9] sm:$0x1] %vm502_vm2, %v733_v31 }
 0x29f   : > { %v735_v33 = vpop.permute.xlu0 %734 }
 0x2a0   : > { %743 = vst.msk [vmem:[#allocation3 + $0xd] sm:$0x1] %vm502_vm2, %v735_v33 }
 0x2a3   : > { %v908_v34 = vpop.permute.xlu0 %907 }
 0x2a4   : > { %916 = vst.msk [vmem:[#allocation3 + $0xe] sm:$0x1] %vm502_vm2, %v908_v34 }
 0x2a7   : > { %v1079_v37 = vpop.permute.xlu0 %1078 }
 0x2a8   : > { %1087 = vst.msk [vmem:[#allocation3 + $0xf] sm:$0x1] %vm502_vm2, %v1079_v37 }
 0x2aa   : > { %v562_v39 = vpop.permute.xlu1 %561 }
 0x2ab   : > { %570 = vst.msk [vmem:[#allocation3 + $0xc] sm:$0x1] %vm502_vm2, %v562_v39 }
 0x2d3   : > { %v2250_v38 = vpop.trf.xlu0 }
 0x2d7   : > { %v2251_v63 = vpop.trf.xlu0 }
 0x31c   : > { %v2850_v43 = vpop.f32.mrb[4].mxu1 }
 0x31d   : > { %v1305_v44 = vmul.f32 %v2850_v43, %v3862_v41  ;;  %v1285_v45 = vpop.f32.mrb[5].mxu1 }
 0x31e   : > { %v1304_v46 = vmul.f32 %v1285_v45, %v3864_v42 }
 0x320   : > { %v2986_v49 = vpack.c.bf16 %v1305_v44, %v1304_v46  ;;  %v2853_v51 = vpop.f32.mrb[6].mxu1 }
 0x321   : > { %v1307_v53 = vmul.f32 %v2853_v51, %v3868_v47  ;;  %v1295_v54 = vpop.f32.mrb[7].mxu1 }
 0x322   : > { %v1306_v56 = vmul.f32 %v1295_v54, %v3870_v48  ;;  %2987 = vmatpush3.bf16.msra.mxu1 %v2986_v49 }
 0x323   : > { %2988 = vmatprep.subr.bf16.mxu1 %v3366_v0 }
 0x324   : > { %v2989_v59 = vpack.c.bf16 %v1307_v53, %v1306_v56 }
 0x326   : > { %2990 = vmatpush3.bf16.msra.mxu1 %v2989_v59 }
 0x327   : > { %2876 = vmatprep.subr.msk.mxu1 %vm1215_vm8, %v1525_v61 }
 0x329   : > { %2863 = vmatmul.mubr.msk.f32.vlgmr.msra.gmra.mrb[8].mxu1 %vm399_vm1, %v1165_v60 }
 0x32a   : > { %2877 = vmatpush3.msk.msra.mxu1 %vm1215_vm8, %v1525_v61  ;;  %2878 = vmatprep.mubr.msk.f32.mxu1 %vm1202_vm7, %v1542_v25 }
 0x32b   : > { %3003 = vmatprep.subr.bf16.mxu1 %v3366_v0 }
 0x32d   : > { %2879 = vmatmul.mubr.msk.f32.vlgmr.msra.gmra.mrb[10].mxu1 %vm1202_vm7, %v1543_v26 }
 0x32e   : > { %2881 = vmatprep.mubr.msk.f32.mxu1 %vm1202_vm7, %v1544_v27  ;;  %3005 = vmatpush3.bf16.msra.mxu1 %v3784_v50  ;;  %v1519_v27 = vadd.f32 %v3877_v57, %v1518_v62 }
 0x32f   : > { %3006 = vmatprep.subr.bf16.mxu1 %v3366_v0 }
 0x331   : > { %2882 = vmatmul.mubr.msk.f32.gmra.mrb[12].mxu1 %vm1202_vm7, %v1545_v29  ;;  %v1879_v29 = vld [vmem:[#allocation3 + $0x8] sm:$0xf] }
 0x332   : > { %3008 = vmatpush3.bf16.msra.mxu1 %v3790_v55  ;;  %2903 = vmatprep.mubr.msk.f32.mxu1 %vm3367_vm0, %v3368_v1 }
 0x333   : > { %3009 = vmatprep.subr.bf16.mxu1 %v3366_v0 }
 0x335   : > { %2904 = vmatmul.mubr.msk.f32.vlgmr.msra.gmra.mrb[14].mxu1 %vm399_vm1, %v2691_v2 }
 0x336   : > { %2922 = vmatprep.mubr.msk.f32.mxu1 %vm3367_vm0, %v3368_v1 }
 0x3fc   : > { %v1377_v4 = vpop.f32.mrb[8].mxu1 }
 0x3fd   : > { %v1382_v52 = vcombine.high %v1377_v4, %v1377_v4  ;;  %v1389_v5 = vrot.slane %v1377_v4, %v3708_v18  ;;  %v2864_v6 = vpop.f32.mrb[9].mxu1 }
 0x3ff   : > { %v1396_v7 = vrot.slane %v1382_v52, %v3708_v18  ;;  %v1397_v8 = vcombine.high %v1389_v5, %v1389_v5  ;;  %v1405_v9 = vrot.slane %v1389_v5, %v3708_v18  ;;  %v2233_v52 = vld [vmem:[#allocation3 + $0xc] sm:$0xf]  ;;  %v2252_v5 = vpop.trf.xlu0 }
 0x400   : > { %v2880_v58 = vpop.f32.mrb[10].mxu1 }
 0x401   : > { %v1398_v10 = vcombine.high %v1396_v7, %v1396_v7  ;;  %v1412_v11 = vrot.slane %v1396_v7, %v3708_v18  ;;  %v1419_v12 = vrot.slane %v1397_v8, %v3708_v18  ;;  %v1427_v13 = vcombine.high %v1405_v9, %v1405_v9  ;;  %1439 = vst.msk [vmem:[%s3906_s20] sm:$0x1] %vm502_vm2, %v1405_v9  ;;  %v1639_v14 = vpop.f32.mrb[11].mxu1 }
 0x402   : > { %v1659_v15 = vmul.f32 %v2880_v58, %v3862_v41  ;;  %v1658_v16 = vmul.f32 %v1639_v14, %v3864_v42 }
 0x403   : > { %v1426_v17 = vrot.slane %v1398_v10, %v3708_v18  ;;  %v1428_v19 = vcombine.high %v1412_v11, %v1412_v11  ;;  %v1429_v3 = vcombine.high %v1419_v12, %v1419_v12  ;;  %1440 = vst.msk [vmem:[%s3906_s20 + $0x4] sm:$0x1] %vm502_vm2, %v1419_v12  ;;  %1441 = vst.msk [vmem:[%s3906_s20 + $0x8] sm:$0x1] %vm502_vm2, %v1427_v13  ;;  %v2253_v6 = vpop.trf.xlu0 }
 0x404   : > { %1443 = vst.msk [vmem:[%s3906_s20 + $0x10] sm:$0x1] %vm502_vm2, %v1412_v11  ;;  %v2998_v20 = vpack.c.bf16 %v1659_v15, %v1658_v16  ;;  %v2883_v21 = vpop.f32.mrb[12].mxu1 }
 0x405   : > { %v1430_v22 = vcombine.high %v1426_v17, %v1426_v17  ;;  %1442 = vst.msk [vmem:[%s3906_s20 + $0xc] sm:$0x1] %vm502_vm2, %v1429_v3  ;;  %1444 = vst.msk [vmem:[%s3906_s20 + $0x14] sm:$0x1] %vm502_vm2, %v1426_v17  ;;  %v1661_v23 = vmul.f32 %v2883_v21, %v3868_v47  ;;  %v1649_v24 = vpop.f32.mrb[13].mxu1 }
 0x406   : > { %1445 = vst.msk [vmem:[%s3906_s20 + $0x18] sm:$0x1] %vm502_vm2, %v1428_v19  ;;  %v1660_v25 = vmul.f32 %v1649_v24, %v3870_v48  ;;  %2999 = vmatpush3.bf16.msra.mxu0 %v2998_v20 }
 0x407   : > { %1446 = vst.msk [vmem:[%s3906_s20 + $0x1c] sm:$0x1] %vm502_vm2, %v1430_v22  ;;  %3000 = vmatprep.subr.bf16.mxu0 %v3366_v0 }
 0x408   : > { %v3001_v26 = vpack.c.bf16 %v1661_v23, %v1660_v25 }
 0x40a   : > { %3002 = vmatpush3.bf16.msra.mxu0 %v3001_v26 }
 0x40b   : > { %2906 = vmatprep.subr.msk.mxu0 %vm1215_vm8, %v1879_v29 }
 0x40d   : > { %2893 = vmatmul.mubr.msk.f32.vlgmr.msra.gmra.mrb[8].mxu0 %vm399_vm1, %v1519_v27 }
 0x40e   : > { %2907 = vmatpush3.msk.msra.mxu0 %vm1215_vm8, %v1879_v29  ;;  %2908 = vmatprep.mubr.msk.f32.mxu0 %vm1202_vm7, %v3845_v28  ;;  %v1872_v28 = vpop.f32.mrb[14].mxu1 }
 0x40f   : > { %3015 = vmatprep.subr.bf16.mxu0 %v3366_v0  ;;  %v2905_v31 = vpop.f32.mrb[15].mxu1  ;;  %v1873_v4 = vadd.f32 %v3877_v57, %v1872_v28 }
 0x411   : > { %2909 = vmatmul.mubr.msk.f32.vlgmr.msra.gmra.mrb[10].mxu0 %vm1202_vm7, %v3847_v30  ;;  %v2699_v30 = vld [vmem:[%s3656_s16 + $0x18] sm:$0xff]  ;;  %s3282_s16 = scalar_lea.vmem %s3281_s10, 1024 }
 0x412   : > { %2911 = vmatprep.mubr.msk.f32.mxu0 %vm1202_vm7, %v3850_v32  ;;  %3017 = vmatpush3.bf16.msra.mxu0 %v3784_v50  ;;  %p3284_p13 = scmp.lt.s32.totalorder %s3282_s16, %s3276_s17 }
 0x413   : > { %3018 = vmatprep.subr.bf16.mxu0 %v3366_v0 }
 0x414   : > { %p3285_p9 = por %p3284_p13, %p3283_p6 }
 0x415   : > { %2912 = vmatmul.mubr.msk.f32.gmra.mrb[12].mxu0 %vm1202_vm7, %v3854_v35 }
 0x416   : > { %3020 = vmatpush3.bf16.msra.mxu0 %v3790_v55  ;;  %2933 = vmatprep.mubr.msk.f32.mxu0 %vm3367_vm0, %v3368_v1  ;;  %p3286_p10 = pnand %p3285_p9, %p3279_p12 }
 0x417   : > { %3021 = vmatprep.subr.bf16.mxu0 %v3366_v0 }
 0x419   : > { %2934 = vmatmul.mubr.msk.f32.vlgmr.msra.gmra.mrb[14].mxu0 %vm399_vm1, %v2699_v30 }
 0x41a   : > { %2952 = vmatprep.mubr.msk.f32.mxu0 %vm3367_vm0, %v3368_v1 }
 0x4e0   : > { %v1731_v50 = vpop.f32.mrb[8].mxu0 }
 0x4e1   : > { %v1736_v32 = vcombine.high %v1731_v50, %v1731_v50  ;;  %v1743_v33 = vrot.slane %v1731_v50, %v3708_v18  ;;  %v2894_v34 = vpop.f32.mrb[9].mxu0 }
 0x4e3   : > { %v1750_v55 = vrot.slane %v1736_v32, %v3708_v18  ;;  %v1751_v35 = vcombine.high %v1743_v33, %v1743_v33  ;;  %v1759_v36 = vrot.slane %v1743_v33, %v3708_v18 }
 0x4e4   : > { %v2910_v37 = vpop.f32.mrb[10].mxu0 }
 0x4e5   : > { %v1752_v39 = vcombine.high %v1750_v55, %v1750_v55  ;;  %v1766_v40 = vrot.slane %v1750_v55, %v3708_v18  ;;  %v1773_v1 = vrot.slane %v1751_v35, %v3708_v18  ;;  %v1781_v43 = vcombine.high %v1759_v36, %v1759_v36  ;;  %1793 = vst.msk [vmem:[%s3906_s20 + $0x1] sm:$0x1] %vm502_vm2, %v1759_v36  ;;  %v1993_v44 = vpop.f32.mrb[11].mxu0 }
 0x4e6   : > { %v2013_v45 = vmul.f32 %v2910_v37, %v3862_v41  ;;  %v2012_v46 = vmul.f32 %v1993_v44, %v3864_v42 }
 0x4e7   : > { %v1780_v49 = vrot.slane %v1752_v39, %v3708_v18  ;;  %v1782_v51 = vcombine.high %v1766_v40, %v1766_v40  ;;  %v1783_v53 = vcombine.high %v1773_v1, %v1773_v1  ;;  %1794 = vst.msk [vmem:[%s3906_s20 + $0x5] sm:$0x1] %vm502_vm2, %v1773_v1  ;;  %1795 = vst.msk [vmem:[%s3906_s20 + $0x9] sm:$0x1] %vm502_vm2, %v1781_v43 }
 0x4e8   : > { %1797 = vst.msk [vmem:[%s3906_s20 + $0x11] sm:$0x1] %vm502_vm2, %v1766_v40  ;;  %v3010_v54 = vpack.c.bf16 %v2013_v45, %v2012_v46  ;;  %v2913_v56 = vpop.f32.mrb[12].mxu0 }
 0x4e9   : > { %v1784_v59 = vcombine.high %v1780_v49, %v1780_v49  ;;  %1796 = vst.msk [vmem:[%s3906_s20 + $0xd] sm:$0x1] %vm502_vm2, %v1783_v53  ;;  %1798 = vst.msk [vmem:[%s3906_s20 + $0x15] sm:$0x1] %vm502_vm2, %v1780_v49  ;;  %v2015_v60 = vmul.f32 %v2913_v56, %v3868_v47  ;;  %v2003_v61 = vpop.f32.mrb[13].mxu0 }
 0x4ea   : > { %1799 = vst.msk [vmem:[%s3906_s20 + $0x19] sm:$0x1] %vm502_vm2, %v1782_v51  ;;  %v2014_v62 = vmul.f32 %v2003_v61, %v3870_v48  ;;  %3011 = vmatpush3.bf16.msra.mxu1 %v3010_v54 }
 0x4eb   : > { %1800 = vst.msk [vmem:[%s3906_s20 + $0x1d] sm:$0x1] %vm502_vm2, %v1784_v59  ;;  %3012 = vmatprep.subr.bf16.mxu1 %v3366_v0 }
 0x4ec   : > { %v3013_v2 = vpack.c.bf16 %v2015_v60, %v2014_v62  ;;  %v2226_v7 = vpop.f32.mrb[14].mxu0 }
 0x4ed   : > { %v2935_v8 = vpop.f32.mrb[15].mxu0  ;;  %v2227_v30 = vadd.f32 %v3877_v57, %v2226_v7 }
 0x4ee   : > { %3014 = vmatpush3.bf16.msra.mxu1 %v3013_v2 }
 0x4ef   : > { %2936 = vmatprep.subr.msk.mxu1 %vm1215_vm8, %v2233_v52 }
 0x4f1   : > { %2923 = vmatmul.mubr.msk.f32.vlgmr.msra.gmra.mrb[16].mxu1 %vm399_vm1, %v1873_v4 }
 0x4f2   : > { %2937 = vmatpush3.msk.msra.mxu1 %vm1215_vm8, %v2233_v52  ;;  %2938 = vmatprep.mubr.msk.f32.mxu1 %vm1202_vm7, %v2250_v38 }
 0x4f5   : > { %2939 = vmatmul.mubr.msk.f32.vlgmr.msra.gmra.mrb[18].mxu1 %vm1202_vm7, %v2251_v63 }
 0x4f6   : > { %2941 = vmatprep.mubr.msk.f32.mxu1 %vm1202_vm7, %v2252_v5 }
 0x4f9   : > { %2942 = vmatmul.mubr.msk.f32.gmra.mrb[20].mxu1 %vm1202_vm7, %v2253_v6 }
 0x5c4   : > { %v2085_v9 = vpop.f32.mrb[16].mxu1 }
 0x5c5   : > { %v2090_v58 = vcombine.high %v2085_v9, %v2085_v9  ;;  %v2097_v10 = vrot.slane %v2085_v9, %v3708_v18  ;;  %v2924_v11 = vpop.f32.mrb[17].mxu1 }
 0x5c7   : > { %v2104_v12 = vrot.slane %v2090_v58, %v3708_v18  ;;  %v2105_v13 = vcombine.high %v2097_v10, %v2097_v10  ;;  %v2113_v14 = vrot.slane %v2097_v10, %v3708_v18 }
 0x5c8   : > { %v2940_v15 = vpop.f32.mrb[18].mxu1 }
 0x5c9   : > { %v2106_v16 = vcombine.high %v2104_v12, %v2104_v12  ;;  %v2120_v17 = vrot.slane %v2104_v12, %v3708_v18  ;;  %v2127_v19 = vrot.slane %v2105_v13, %v3708_v18  ;;  %v2135_v3 = vcombine.high %v2113_v14, %v2113_v14  ;;  %2147 = vst.msk [vmem:[%s3906_s20 + $0x2] sm:$0x1] %vm502_vm2, %v2113_v14  ;;  %v2347_v20 = vpop.f32.mrb[19].mxu1 }
 0x5ca   : > { %v2367_v21 = vmul.f32 %v2940_v15, %v3862_v41  ;;  %v2366_v22 = vmul.f32 %v2347_v20, %v3864_v42 }
 0x5cb   : > { %v2134_v23 = vrot.slane %v2106_v16, %v3708_v18  ;;  %v2136_v24 = vcombine.high %v2120_v17, %v2120_v17  ;;  %v2137_v25 = vcombine.high %v2127_v19, %v2127_v19  ;;  %2148 = vst.msk [vmem:[%s3906_s20 + $0x6] sm:$0x1] %vm502_vm2, %v2127_v19  ;;  %2149 = vst.msk [vmem:[%s3906_s20 + $0xa] sm:$0x1] %vm502_vm2, %v2135_v3 }
 0x5cc   : > { %2151 = vst.msk [vmem:[%s3906_s20 + $0x12] sm:$0x1] %vm502_vm2, %v2120_v17  ;;  %v3022_v26 = vpack.c.bf16 %v2367_v21, %v2366_v22  ;;  %v2943_v27 = vpop.f32.mrb[20].mxu1 }
 0x5cd   : > { %v2138_v29 = vcombine.high %v2134_v23, %v2134_v23  ;;  %2150 = vst.msk [vmem:[%s3906_s20 + $0xe] sm:$0x1] %vm502_vm2, %v2137_v25  ;;  %2152 = vst.msk [vmem:[%s3906_s20 + $0x16] sm:$0x1] %vm502_vm2, %v2134_v23  ;;  %v2369_v41 = vmul.f32 %v2943_v27, %v3868_v47  ;;  %v2357_v42 = vpop.f32.mrb[21].mxu1 }
 0x5ce   : > { %2153 = vst.msk [vmem:[%s3906_s20 + $0x1a] sm:$0x1] %vm502_vm2, %v2136_v24  ;;  %3023 = vmatpush3.bf16.msra.mxu0 %v3022_v26  ;;  %v2368_v28 = vmul.f32 %v2357_v42, %v3870_v48 }
 0x5cf   : > { %2154 = vst.msk [vmem:[%s3906_s20 + $0x1e] sm:$0x1] %vm502_vm2, %v2138_v29  ;;  %3024 = vmatprep.subr.bf16.mxu0 %v3366_v0 }
 0x5d0   : > { %v3025_v31 = vpack.c.bf16 %v2369_v41, %v2368_v28 }
 0x5d2   : > { %3026 = vmatpush3.bf16.msra.mxu0 %v3025_v31 }
 0x5d5   : > { %2953 = vmatmul.mubr.msk.f32.vlgmr.msra.gmra.mrb[16].mxu0 %vm399_vm1, %v2227_v30 }
 0x6a8   : > { %v2439_v50 = vpop.f32.mrb[16].mxu0 }
 0x6a9   : > { %v2444_v32 = vcombine.high %v2439_v50, %v2439_v50  ;;  %v2451_v47 = vrot.slane %v2439_v50, %v3708_v18  ;;  %v2954_v33 = vpop.f32.mrb[17].mxu0 }
 0x6ab   : > { %v2458_v48 = vrot.slane %v2444_v32, %v3708_v18  ;;  %v2459_v34 = vcombine.high %v2451_v47, %v2451_v47  ;;  %v2467_v0 = vrot.slane %v2451_v47, %v3708_v18 }
 0x6ad   : > { %v2460_v57 = vcombine.high %v2458_v48, %v2458_v48  ;;  %v2474_v55 = vrot.slane %v2458_v48, %v3708_v18  ;;  %v2481_v35 = vrot.slane %v2459_v34, %v3708_v18  ;;  %v2489_v36 = vcombine.high %v2467_v0, %v2467_v0  ;;  %2501 = vst.msk [vmem:[%s3906_s20 + $0x3] sm:$0x1] %vm502_vm2, %v2467_v0 }
 0x6af   : > { %v2488_v37 = vrot.slane %v2460_v57, %v3708_v18  ;;  %v2490_v38 = vcombine.high %v2474_v55, %v2474_v55  ;;  %v2491_v39 = vcombine.high %v2481_v35, %v2481_v35  ;;  %2502 = vst.msk [vmem:[%s3906_s20 + $0x7] sm:$0x1] %vm502_vm2, %v2481_v35  ;;  %2503 = vst.msk [vmem:[%s3906_s20 + $0xb] sm:$0x1] %vm502_vm2, %v2489_v36 }
 0x6b0   : > { %2505 = vst.msk [vmem:[%s3906_s20 + $0x13] sm:$0x1] %vm502_vm2, %v2474_v55 }
 0x6b1   : > { %v2492_v18 = vcombine.high %v2488_v37, %v2488_v37  ;;  %2504 = vst.msk [vmem:[%s3906_s20 + $0xf] sm:$0x1] %vm502_vm2, %v2491_v39  ;;  %2506 = vst.msk [vmem:[%s3906_s20 + $0x17] sm:$0x1] %vm502_vm2, %v2488_v37 }
 0x6b2   : > { %2507 = vst.msk [vmem:[%s3906_s20 + $0x1b] sm:$0x1] %vm502_vm2, %v2490_v38 }
 0x6b3   : > { %2508 = vst.msk [vmem:[%s3906_s20 + $0x1f] sm:$0x1] %vm502_vm2, %v2492_v18 }
 0x6b4   : > { %3289 = shalt.err (!%p3286_p10)
}
 0x6b5   : > { %s3290_s0 = scalar_lea.hbm %s4036_s22, 512  ;;  %s3294_s29 = scalar_lea.hbm %s4097_s7, 1024 }
 0x6b6   : > { %p3291_p3 = scmp.ne.s32.totalorder %s4036_s22, %s3290_s0  ;;  %p3295_p1 = scmp.lt.u32.totalorder %s4036_s22, %s4097_s7 }
 0x6b7   : > { %p3296_p4 = scmp.lt.u32.totalorder %s3294_s29, %s3290_s0  ;;  %p3298_p8 = scmp.lt.u32.totalorder %s3290_s0, %s4036_s22 }
 0x6b8   : > { %p3292_p7 = pnand %p3291_p3, %p4132_p5 }
 0x6b9   : > { %p3297_p0 = por %p3296_p4, %p3295_p1 }
 0x6ba   : > { %p3293_p2 = pneg %p3292_p7 }
 0x6bb   : > { %p3299_p11 = por %p3298_p8, %p3297_p0 }
 0x6bd   : > { %p3300_p12 = pnand %p3299_p11, %p3293_p2 }
 0x6bf   : > { %3303 = shalt.err (!%p3300_p12)
}
 0x6c0   : > { %s3372_s23 = smov 64   ;;  %s3373_s11 = smov 128  }
 0x6c1   : > { %s3374_s30 = smov 4  }
 0x6c2   : > { %3043 = dma.vmem_to_hbm [thread:$0]  (%p4132_p5), %s4038_s2, 512, %s4036_s22, %s2510_s3, %s3372_s23, %s3373_s11, %s3374_s30  }
 0x6c3 PF: > { %s4133_s20 = sld [smem:[#allocation21_spill]]  ;;  %s2537_s14 = sand.u32 1, %s3342_s24  }
 0x6c4   : > { %p4135_p13 = scmp.ge.s32.totalorder %s3354_s27, 2  ;;  %s2538_s28 = scalar_lea.sflag [#allocation6], %s2537_s14 }
 0x6c9   : > { %p4134_p6 = scmp.ne.s32.totalorder %s4133_s20, 0 }
 0x6cb   : > { %p3063_p9 = pnand %p4135_p13, %p4134_p6 }
 0x6cd   : > { %3337 = dma.done.wait (!%p3063_p9), %s2538_s28, 512  }
 0x6ce   : > { %3339 = vsyncadd (!%p3063_p9), %s2538_s28, 4294966784  ;;  %s4136_s27 = sld [smem:[#allocation19_spill]]  ;;  %s4137_s19 = sld [smem:[#allocation20_spill]] }
 0x6cf   : > { %s4138_s24 = smov %s3346_s25  ;;  %s4139_s25 = smov %s3350_s26 }
 0x6d4   : > { %p24_p10 = scmp.ge.s32.totalorder %s4136_s27, 4   ;;  %s4140_s26 = smov %s4137_s19 }
 0x6d6   :  { %26 = sbr.rel (!%p24_p10) target bundleno = 12 (0xc), region = 130 }
 0x6dd   :  { %2543 = vsyncpa [#allocation5], 1 }
 0x6de   :  { %2545 = vsyncpa [#allocation5 + $0x1], 1 }
 0x6df   :  { %2546 = vsyncpa [#allocation8], 1 }
 0x6e0   :  { %2548 = vsyncpa [#allocation8 + $0x1], 1 }
 0x6e1   :  { %2549 = vsyncpa [#allocation11], 1 }
 0x6e2   :  { %2550 = vsyncpa [#allocation6], 1 }
 0x6e3   :  { %2552 = vsyncpa [#allocation6 + $0x1], 1 }

</bundles_post_ra>
